<compile_context>
chip_gen: v5e
topology: v5e:2x2
jax: 0.10.0
libtpu: 0.0.40
codegen_flags: <defaults>
</compile_context>

<pallas_src>
import functools

import jax
import jax.numpy as jnp
from jax import lax
from jax.experimental import pallas as pl
from jax.experimental.pallas import tpu as pltpu


# ---------------------------------------------------------------------------
# Reference surrogates (plain JAX; documentation only, unused by the kernel).
# TODO(synk): `data.sub_smooth_grad` / `data.sub_objective` are not defined in
# the PyTorch source; we use a quadratic least-squares surrogate:
#   grad = J^T (J y - F),  objective = 0.5 * (J y - F)^2
# TODO(synk): the `SelfAttention` class is not defined in the reference; we use
# standard single-head scaled-dot-product attention (Wq/Wk/Wv/Wo, no biases).
# TODO(synk): nn.Dropout(p=0.2) is declared in the module but never applied in
# forward(), so it is intentionally omitted.
# ---------------------------------------------------------------------------
def sub_smooth_grad(y, J, F):
    r = jnp.einsum('bvw,bwo->bvo', J, y) - F
    return jnp.einsum('bwv,bwo->bvo', J, r)


def sub_objective(y, J, F):
    r = jnp.einsum('bvw,bwo->bvo', J, y) - F
    return 0.5 * r * r


# ---------------------------------------------------------------------------
# Fused per-batch kernel: all iter_step optimizer iterations in one grid step.
# ---------------------------------------------------------------------------
def _lstm_iter_kernel(iter_step, hidden_dim,
                      j_ref, f_ref, y0r_ref, y0c_ref,
                      w1eff_ref, u1_ref, w2_ref, u2_ref,
                      b1_ref, b2_ref, wht_ref,
                      qk_ref, wv_ref, bh_ref,
                      ys_ref, ssq_ref):
    H = hidden_dim
    jb = j_ref[0]                       # (V, V)   this batch's Jacobian
    f = f_ref[0]                        # (V, 1)
    y_row = y0r_ref[0]                  # (1, V)
    y_col = y0c_ref[0]                  # (V, 1)
    V = jb.shape[0]

    w1eff = w1eff_ref[...]              # (2, 4H)  Wo @ W1 (u-cols x2)
    u1w = u1_ref[...]                   # (H, 4H)
    w2w = w2_ref[...]                   # (H, 4H)
    u2w = u2_ref[...]                   # (H, 4H)
    b1 = b1_ref[...]                    # (1, 4H)
    b2 = b2_ref[...]                    # (1, 4H)
    wht = wht_ref[...]                  # (1, H)

    # SMEM scalar params (folded attention matrices + output bias).
    qk00 = qk_ref[0, 0]; qk01 = qk_ref[0, 1]
    qk10 = qk_ref[1, 0]; qk11 = qk_ref[1, 1]
    wv00 = wv_ref[0, 0]; wv01 = wv_ref[0, 1]
    wv10 = wv_ref[1, 0]; wv11 = wv_ref[1, 1]
    bh = bh_ref[0]

    w1e0 = w1eff[0:1, :]                # (1, 4H)
    w1e1 = w1eff[1:2, :]

    # Hoisted constants: identity mask for transpose-free row<->col flips, and
    # the lane mask selecting sigmoid (i|f|o) vs tanh (u) gate lanes.
    ri = lax.broadcasted_iota(jnp.int32, (V, V), 0)
    ci = lax.broadcasted_iota(jnp.int32, (V, V), 1)
    eyef = (ri == ci).astype(jnp.float32)
    lane = lax.broadcasted_iota(jnp.int32, (V, 4 * H), 1)
    is_sig = lane < 3 * H

    h1 = jnp.zeros((V, H), jnp.float32)
    c1 = jnp.zeros((V, H), jnp.float32)
    h2 = jnp.zeros((V, H), jnp.float32)
    c2 = jnp.zeros((V, H), jnp.float32)

    # Residual r = J y - F (column); reused as the next iteration's grad source.
    r = jnp.sum(jb * y_row, axis=-1, keepdims=True) - f

    y_rows = []
    ssqs = []

    for _ in range(iter_step):          # static unroll (iter_step is small)
        # ---- grad_init = J^T r (sublane reduce; J^T never materialized) -------
        g_row = jnp.sum(jb * r, axis=0, keepdims=True)              # (1, V)
        g_col = jnp.sum(eyef * g_row, axis=-1, keepdims=True)       # (V, 1)

        # ---- single-head self-attention over V tokens [y_i, g_i] --------------
        # scores = X (Wq Wk^T / sqrt(D)) X^T : 4 VPU outer-product FMAs, no MXU.
        scores = (qk00 * (y_col * y_row) + qk01 * (y_col * g_row)
                  + qk10 * (g_col * y_row) + qk11 * (g_col * g_row))  # (V, V)
        smax = jnp.max(scores, axis=-1, keepdims=True)
        sexp = jnp.exp(scores - smax)
        attn = sexp * pl.reciprocal(jnp.sum(sexp, axis=-1, keepdims=True),
                                    approx=True)

        # values (2 features) and context, still without any MXU matmul
        v0_row = wv00 * y_row + wv10 * g_row                         # (1, V)
        v1_row = wv01 * y_row + wv11 * g_row
        ctx0 = jnp.sum(attn * v0_row, axis=-1, keepdims=True)        # (V, 1)
        ctx1 = jnp.sum(attn * v1_row, axis=-1, keepdims=True)

        # ---- LSTM layer 1: input path on VPU (Wo@W1 folded), recurrent on MXU -
        z1 = (ctx0 * w1e0 + ctx1 * w1e1
              + jnp.dot(h1, u1w, preferred_element_type=jnp.float32) + b1)
        s1 = jax.nn.sigmoid(z1)                                      # lane-dense
        gate1 = jnp.where(is_sig, s1, 2.0 * s1 - 1.0)                # tanh = 2s-1
        i1 = gate1[:, 0:H]
        f1 = gate1[:, H:2 * H]
        o1 = gate1[:, 2 * H:3 * H]
        u1g = gate1[:, 3 * H:]
        c1 = i1 * u1g + f1 * c1
        h1 = o1 * jnp.tanh(c1)

        # ---- LSTM layer 2 ------------------------------------------------------
        z2 = (jnp.dot(h1, w2w, preferred_element_type=jnp.float32)
              + jnp.dot(h2, u2w, preferred_element_type=jnp.float32) + b2)
        s2 = jax.nn.sigmoid(z2)
        gate2 = jnp.where(is_sig, s2, 2.0 * s2 - 1.0)
        i2 = gate2[:, 0:H]
        f2 = gate2[:, H:2 * H]
        o2 = gate2[:, 2 * H:3 * H]
        u2g = gate2[:, 3 * H:]
        c2 = i2 * u2g + f2 * c2
        h2 = o2 * jnp.tanh(c2)

        # ---- output projection (VPU + lane reduce) and y update ----------------
        grad_col = jnp.sum(h2 * wht, axis=-1, keepdims=True) + bh    # (V, 1)
        grad_row = jnp.sum(eyef * grad_col, axis=0, keepdims=True)   # (1, V)
        y_col = y_col - grad_col
        y_row = y_row - grad_row

        # ---- refresh residual; per-iteration sum of squared residuals ----------
        r = jnp.sum(jb * y_row, axis=-1, keepdims=True) - f
        ssqs.append(jnp.sum(r * r, axis=0, keepdims=True))           # (1, 1)
        y_rows.append(y_row)

    # Single store per output per grid step.
    ys_ref[0] = jnp.concatenate(y_rows, axis=0)                      # (iter_step, V)
    ssq_ref[0] = jnp.concatenate(ssqs, axis=-1)                      # (1, iter_step)


# ---------------------------------------------------------------------------
# Parameter init (shapes match the PyTorch __init__; packed for the kernel).
# Gate stacking order is [i | f | o | u]; the module has separate W/U/b per
# gate, so the packing is purely an implementation-side layout choice.
# ---------------------------------------------------------------------------
def init_params(key, input_dim, hidden_dim):
    H = hidden_dim
    ks = jax.random.split(key, 21)

    def nrm(k, shape):
        return 0.01 * jax.random.normal(k, shape, jnp.float32)

    W1 = jnp.concatenate([nrm(ks[i], (input_dim, H)) for i in range(4)], axis=1)
    U1 = jnp.concatenate([nrm(ks[4 + i], (H, H)) for i in range(4)], axis=1)
    W2 = jnp.concatenate([nrm(ks[8 + i], (H, H)) for i in range(4)], axis=1)
    U2 = jnp.concatenate([nrm(ks[12 + i], (H, H)) for i in range(4)], axis=1)
    Wh = nrm(ks[16], (H, 1))
    Wq = nrm(ks[17], (input_dim, input_dim))
    Wk = nrm(ks[18], (input_dim, input_dim))
    Wv = nrm(ks[19], (input_dim, input_dim))
    Wo = nrm(ks[20], (input_dim, input_dim))
    b1 = jnp.zeros((1, 4 * H), jnp.float32)
    b2 = jnp.zeros((1, 4 * H), jnp.float32)
    bh = jnp.zeros((1,), jnp.float32)

    # ---- packed / folded layouts consumed by the fused kernel --------------
    # u-gate (tanh) columns carry a 2x fold so tanh(x) = 2*sigmoid(2x) - 1 can
    # be derived from one lane-dense sigmoid over the full (V, 4H) tile.
    def fold2(m):
        return m.at[..., 3 * H:4 * H].multiply(2.0)

    W1eff = fold2(Wo @ W1)                                  # (in, 4H): Wo folded in
    QK2 = (Wq @ Wk.T) / jnp.sqrt(jnp.float32(input_dim))    # (in, in)

    return dict(W1eff=W1eff, U1=fold2(U1), W2=fold2(W2), U2=fold2(U2),
                b1=fold2(b1), b2=fold2(b2), WhT=Wh.T, bh=bh, QK2=QK2, Wv=Wv)


# ---------------------------------------------------------------------------
# Full forward pass (mirrors LSTM.forward). One pallas_call per forward.
# ---------------------------------------------------------------------------
@functools.partial(jax.jit, static_argnames=("iter_step", "hidden_dim"))
def lstm_forward(params, y, J, F, iter_step, hidden_dim):
    B, V, _ = y.shape

    y_col = y.astype(jnp.float32)                 # (B, V, 1)
    y_row = jnp.swapaxes(y_col, 1, 2)             # (B, 1, V)
    Jf = J.astype(jnp.float32)
    Ff = F.astype(jnp.float32)

    kernel = functools.partial(_lstm_iter_kernel, iter_step, hidden_dim)
    vmem = pl.BlockSpec(memory_space=pltpu.MemorySpace.VMEM)
    smem = pl.BlockSpec(memory_space=pltpu.MemorySpace.SMEM)

    ys, ssq = pl.pallas_call(
        kernel,
        out_shape=(jax.ShapeDtypeStruct((B, iter_step, V), jnp.float32),
                   jax.ShapeDtypeStruct((B, 1, iter_step), jnp.float32)),
        grid=(B,),
        in_specs=[
            pl.BlockSpec((1, V, V), lambda b: (b, 0, 0)),   # J
            pl.BlockSpec((1, V, 1), lambda b: (b, 0, 0)),   # F
            pl.BlockSpec((1, 1, V), lambda b: (b, 0, 0)),   # y0 (row layout)
            pl.BlockSpec((1, V, 1), lambda b: (b, 0, 0)),   # y0 (col layout)
            vmem, vmem, vmem, vmem, vmem, vmem, vmem,       # W1eff,U1,W2,U2,b1,b2,WhT
            smem, smem, smem,                               # QK2, Wv, bh
        ],
        out_specs=(pl.BlockSpec((1, iter_step, V), lambda b: (b, 0, 0)),
                   pl.BlockSpec((1, 1, iter_step), lambda b: (b, 0, 0))),
        compiler_params=pltpu.CompilerParams(
            dimension_semantics=("parallel",)),
    )(Jf, Ff, y_row, y_col,
      params["W1eff"], params["U1"], params["W2"], params["U2"],
      params["b1"], params["b2"], params["WhT"],
      params["QK2"], params["Wv"], params["bh"])

    # Global per-iteration loss (mean of 0.5*r^2 over all B*V elements / iter_step),
    # matching the reference's loss accumulation; best-y picked by the GLOBAL loss.
    losses = 0.5 * jnp.sum(ssq[:, 0, :], axis=0) / (B * V * iter_step)  # (iter_step,)
    final_loss = jnp.sum(losses)
    best_it = jnp.argmin(losses)           # first minimum == "strict <" update rule
    final_y = jnp.take(ys, best_it, axis=1)[..., None]                  # (B, V, 1)
    return final_y, final_loss, losses


if __name__ == "__main__":
    key = jax.random.PRNGKey(0)
    k_y, k_J, k_F, k_p = jax.random.split(key, 4)

    # Shapes implied by forward(): y: (batch, num_var, 1),
    # J: (batch, num_var, num_var), F: (batch, num_var, 1),
    # input_dim = 2 (concat of y and grad_init), hidden_dim = 32.
    B, V, hidden_dim, iter_step = 2, 16, 32, 3
    input_dim = 2

    y = jax.random.normal(k_y, (B, V, 1), jnp.float32)
    J = 0.1 * jax.random.normal(k_J, (B, V, V), jnp.float32)
    F = jax.random.normal(k_F, (B, V, 1), jnp.float32)

    params = init_params(k_p, input_dim, hidden_dim)

    final_y, final_loss, losses = lstm_forward(params, y, J, F,
                                               iter_step=iter_step,
                                               hidden_dim=hidden_dim)
    jax.block_until_ready((final_y, final_loss, losses))

    assert final_y.shape == (B, V, 1)
    assert final_loss.shape == ()
    assert losses.shape == (iter_step,)
    assert bool(jnp.all(jnp.isfinite(final_y)))
    assert bool(jnp.isfinite(final_loss))

    print("KERNEL_OK")
</pallas_src>

<mosaic_0001>
module attributes {stable_mosaic.version = 11 : i64} {
  func.func @_lstm_iter_kernel(%arg0: i32, %arg1: memref<1x16x16xf32, #tpu.memory_space<vmem>>, %arg2: memref<1x16x1xf32, #tpu.memory_space<vmem>>, %arg3: memref<1x1x16xf32, #tpu.memory_space<vmem>>, %arg4: memref<1x16x1xf32, #tpu.memory_space<vmem>>, %arg5: memref<2x128xf32, #tpu.memory_space<vmem>>, %arg6: memref<32x128xf32, #tpu.memory_space<vmem>>, %arg7: memref<32x128xf32, #tpu.memory_space<vmem>>, %arg8: memref<32x128xf32, #tpu.memory_space<vmem>>, %arg9: memref<1x128xf32, #tpu.memory_space<vmem>>, %arg10: memref<1x128xf32, #tpu.memory_space<vmem>>, %arg11: memref<1x32xf32, #tpu.memory_space<vmem>>, %arg12: memref<2x2xf32, #tpu.memory_space<smem>>, %arg13: memref<2x2xf32, #tpu.memory_space<smem>>, %arg14: memref<1xf32, #tpu.memory_space<smem>>, %arg15: memref<1x3x16xf32, #tpu.memory_space<vmem>>, %arg16: memref<1x1x3xf32, #tpu.memory_space<vmem>>) attributes {dimension_semantics = [#tpu.dimension_semantics<parallel>], iteration_bounds = array<i64: 2>, scalar_prefetch = 0 : i64, scratch_operands = 0 : i64, tpu.core_type = #tpu.core_type<tc>, window_params = [{transform_indices = @transform_0, window_bounds = array<i64: 1, 16, 16>}, {transform_indices = @transform_1, window_bounds = array<i64: 1, 16, 1>}, {transform_indices = @transform_2, window_bounds = array<i64: 1, 1, 16>}, {transform_indices = @transform_3, window_bounds = array<i64: 1, 16, 1>}, {pipeline_mode = #tpu.pipeline_mode<synchronous>, transform_indices = @transform_4, window_bounds = array<i64: 2, 128>}, {pipeline_mode = #tpu.pipeline_mode<synchronous>, transform_indices = @transform_5, window_bounds = array<i64: 32, 128>}, {pipeline_mode = #tpu.pipeline_mode<synchronous>, transform_indices = @transform_6, window_bounds = array<i64: 32, 128>}, {pipeline_mode = #tpu.pipeline_mode<synchronous>, transform_indices = @transform_7, window_bounds = array<i64: 32, 128>}, {pipeline_mode = #tpu.pipeline_mode<synchronous>, transform_indices = @transform_8, window_bounds = array<i64: 1, 128>}, {pipeline_mode = #tpu.pipeline_mode<synchronous>, transform_indices = @transform_9, window_bounds = array<i64: 1, 128>}, {pipeline_mode = #tpu.pipeline_mode<synchronous>, transform_indices = @transform_10, window_bounds = array<i64: 1, 32>}, {transform_indices = @transform_11, window_bounds = array<i64: 2, 2>}, {transform_indices = @transform_12, window_bounds = array<i64: 2, 2>}, {transform_indices = @transform_13, window_bounds = array<i64: 1>}, {transform_indices = @transform_14, window_bounds = array<i64: 1, 3, 16>}, {transform_indices = @transform_15, window_bounds = array<i64: 1, 1, 3>}]} {
    %c0 = arith.constant 0 : index
    %c0_0 = arith.constant 0 : index
    %c0_1 = arith.constant 0 : index
    %0 = vector.load %arg1[%c0, %c0_0, %c0_1] : memref<1x16x16xf32, #tpu.memory_space<vmem>>, vector<1x16x16xf32>
    %1 = vector.shape_cast %0 : vector<1x16x16xf32> to vector<16x16xf32>
    %c0_2 = arith.constant 0 : index
    %c0_3 = arith.constant 0 : index
    %c0_4 = arith.constant 0 : index
    %2 = vector.load %arg2[%c0_2, %c0_3, %c0_4] : memref<1x16x1xf32, #tpu.memory_space<vmem>>, vector<1x16x1xf32>
    %3 = vector.shape_cast %2 : vector<1x16x1xf32> to vector<16x1xf32>
    %c0_5 = arith.constant 0 : index
    %c0_6 = arith.constant 0 : index
    %c0_7 = arith.constant 0 : index
    %4 = vector.load %arg3[%c0_5, %c0_6, %c0_7] : memref<1x1x16xf32, #tpu.memory_space<vmem>>, vector<1x1x16xf32>
    %5 = vector.shape_cast %4 : vector<1x1x16xf32> to vector<1x16xf32>
    %c0_8 = arith.constant 0 : index
    %c0_9 = arith.constant 0 : index
    %c0_10 = arith.constant 0 : index
    %6 = vector.load %arg4[%c0_8, %c0_9, %c0_10] : memref<1x16x1xf32, #tpu.memory_space<vmem>>, vector<1x16x1xf32>
    %7 = vector.shape_cast %6 : vector<1x16x1xf32> to vector<16x1xf32>
    %c0_11 = arith.constant 0 : index
    %c0_12 = arith.constant 0 : index
    %8 = vector.load %arg5[%c0_11, %c0_12] : memref<2x128xf32, #tpu.memory_space<vmem>>, vector<2x128xf32>
    %c0_13 = arith.constant 0 : index
    %c0_14 = arith.constant 0 : index
    %9 = vector.load %arg6[%c0_13, %c0_14] : memref<32x128xf32, #tpu.memory_space<vmem>>, vector<32x128xf32>
    %c0_15 = arith.constant 0 : index
    %c0_16 = arith.constant 0 : index
    %10 = vector.load %arg7[%c0_15, %c0_16] : memref<32x128xf32, #tpu.memory_space<vmem>>, vector<32x128xf32>
    %c0_17 = arith.constant 0 : index
    %c0_18 = arith.constant 0 : index
    %11 = vector.load %arg8[%c0_17, %c0_18] : memref<32x128xf32, #tpu.memory_space<vmem>>, vector<32x128xf32>
    %c0_19 = arith.constant 0 : index
    %c0_20 = arith.constant 0 : index
    %12 = vector.load %arg9[%c0_19, %c0_20] : memref<1x128xf32, #tpu.memory_space<vmem>>, vector<1x128xf32>
    %c0_21 = arith.constant 0 : index
    %c0_22 = arith.constant 0 : index
    %13 = vector.load %arg10[%c0_21, %c0_22] : memref<1x128xf32, #tpu.memory_space<vmem>>, vector<1x128xf32>
    %c0_23 = arith.constant 0 : index
    %c0_24 = arith.constant 0 : index
    %14 = vector.load %arg11[%c0_23, %c0_24] : memref<1x32xf32, #tpu.memory_space<vmem>>, vector<1x32xf32>
    %c0_25 = arith.constant 0 : index
    %c0_26 = arith.constant 0 : index
    %15 = memref.load %arg12[%c0_25, %c0_26] : memref<2x2xf32, #tpu.memory_space<smem>>
    %c0_27 = arith.constant 0 : index
    %c1 = arith.constant 1 : index
    %16 = memref.load %arg12[%c0_27, %c1] : memref<2x2xf32, #tpu.memory_space<smem>>
    %c1_28 = arith.constant 1 : index
    %c0_29 = arith.constant 0 : index
    %17 = memref.load %arg12[%c1_28, %c0_29] : memref<2x2xf32, #tpu.memory_space<smem>>
    %c1_30 = arith.constant 1 : index
    %c1_31 = arith.constant 1 : index
    %18 = memref.load %arg12[%c1_30, %c1_31] : memref<2x2xf32, #tpu.memory_space<smem>>
    %c0_32 = arith.constant 0 : index
    %c0_33 = arith.constant 0 : index
    %19 = memref.load %arg13[%c0_32, %c0_33] : memref<2x2xf32, #tpu.memory_space<smem>>
    %c0_34 = arith.constant 0 : index
    %c1_35 = arith.constant 1 : index
    %20 = memref.load %arg13[%c0_34, %c1_35] : memref<2x2xf32, #tpu.memory_space<smem>>
    %c1_36 = arith.constant 1 : index
    %c0_37 = arith.constant 0 : index
    %21 = memref.load %arg13[%c1_36, %c0_37] : memref<2x2xf32, #tpu.memory_space<smem>>
    %c1_38 = arith.constant 1 : index
    %c1_39 = arith.constant 1 : index
    %22 = memref.load %arg13[%c1_38, %c1_39] : memref<2x2xf32, #tpu.memory_space<smem>>
    %c0_40 = arith.constant 0 : index
    %23 = memref.load %arg14[%c0_40] : memref<1xf32, #tpu.memory_space<smem>>
    %24 = vector.extract_strided_slice %8 {offsets = [0, 0], sizes = [1, 128], strides = [1, 1]} : vector<2x128xf32> to vector<1x128xf32>
    %25 = vector.extract_strided_slice %8 {offsets = [1, 0], sizes = [1, 128], strides = [1, 1]} : vector<2x128xf32> to vector<1x128xf32>
    %26 = tpu.iota {dimensions = array<i32: 0>} : vector<16x16xi32>
    %27 = tpu.iota {dimensions = array<i32: 1>} : vector<16x16xi32>
    %28 = arith.cmpi eq, %26, %27 : vector<16x16xi32>
    %29 = arith.extui %28 : vector<16x16xi1> to vector<16x16xi32>
    %30 = arith.sitofp %29 : vector<16x16xi32> to vector<16x16xf32>
    %31 = tpu.iota {dimensions = array<i32: 1>} : vector<16x128xi32>
    %c96_i32 = arith.constant 96 : i32
    %32 = vector.broadcast %c96_i32 : i32 to vector<16x128xi32>
    %33 = arith.cmpi slt, %31, %32 : vector<16x128xi32>
    %cst = arith.constant 0.000000e+00 : f32
    %34 = vector.broadcast %cst : f32 to vector<16x32xf32>
    %cst_41 = arith.constant 0.000000e+00 : f32
    %35 = vector.broadcast %cst_41 : f32 to vector<16x32xf32>
    %cst_42 = arith.constant 0.000000e+00 : f32
    %36 = vector.broadcast %cst_42 : f32 to vector<16x32xf32>
    %cst_43 = arith.constant 0.000000e+00 : f32
    %37 = vector.broadcast %cst_43 : f32 to vector<16x32xf32>
    %38 = vector.broadcast %5 : vector<1x16xf32> to vector<16x16xf32>
    %39 = arith.mulf %1, %38 : vector<16x16xf32>
    %cst_44 = arith.constant dense<0.000000e+00> : vector<16xf32>
    %40 = vector.multi_reduction <add>, %39, %cst_44 [1] : vector<16x16xf32> to vector<16xf32>
    %41 = vector.shape_cast %40 : vector<16xf32> to vector<16x1xf32>
    %42 = arith.subf %41, %3 : vector<16x1xf32>
    %43 = vector.broadcast %42 : vector<16x1xf32> to vector<16x16xf32>
    %44 = arith.mulf %1, %43 : vector<16x16xf32>
    %cst_45 = arith.constant dense<0.000000e+00> : vector<16xf32>
    %45 = vector.multi_reduction <add>, %44, %cst_45 [0] : vector<16x16xf32> to vector<16xf32>
    %46 = vector.shape_cast %45 : vector<16xf32> to vector<1x16xf32>
    %47 = vector.broadcast %46 : vector<1x16xf32> to vector<16x16xf32>
    %48 = arith.mulf %30, %47 : vector<16x16xf32>
    %cst_46 = arith.constant dense<0.000000e+00> : vector<16xf32>
    %49 = vector.multi_reduction <add>, %48, %cst_46 [1] : vector<16x16xf32> to vector<16xf32>
    %50 = vector.shape_cast %49 : vector<16xf32> to vector<16x1xf32>
    %51 = vector.broadcast %7 : vector<16x1xf32> to vector<16x16xf32>
    %52 = vector.broadcast %5 : vector<1x16xf32> to vector<16x16xf32>
    %53 = arith.mulf %51, %52 : vector<16x16xf32>
    %54 = vector.broadcast %15 : f32 to vector<16x16xf32>
    %55 = arith.mulf %54, %53 : vector<16x16xf32>
    %56 = vector.broadcast %7 : vector<16x1xf32> to vector<16x16xf32>
    %57 = vector.broadcast %46 : vector<1x16xf32> to vector<16x16xf32>
    %58 = arith.mulf %56, %57 : vector<16x16xf32>
    %59 = vector.broadcast %16 : f32 to vector<16x16xf32>
    %60 = arith.mulf %59, %58 : vector<16x16xf32>
    %61 = arith.addf %55, %60 : vector<16x16xf32>
    %62 = vector.broadcast %50 : vector<16x1xf32> to vector<16x16xf32>
    %63 = vector.broadcast %5 : vector<1x16xf32> to vector<16x16xf32>
    %64 = arith.mulf %62, %63 : vector<16x16xf32>
    %65 = vector.broadcast %17 : f32 to vector<16x16xf32>
    %66 = arith.mulf %65, %64 : vector<16x16xf32>
    %67 = arith.addf %61, %66 : vector<16x16xf32>
    %68 = vector.broadcast %50 : vector<16x1xf32> to vector<16x16xf32>
    %69 = vector.broadcast %46 : vector<1x16xf32> to vector<16x16xf32>
    %70 = arith.mulf %68, %69 : vector<16x16xf32>
    %71 = vector.broadcast %18 : f32 to vector<16x16xf32>
    %72 = arith.mulf %71, %70 : vector<16x16xf32>
    %73 = arith.addf %67, %72 : vector<16x16xf32>
    %cst_47 = arith.constant dense<0xFF800000> : vector<16xf32>
    %74 = vector.multi_reduction <maximumf>, %73, %cst_47 [1] : vector<16x16xf32> to vector<16xf32>
    %75 = vector.shape_cast %74 : vector<16xf32> to vector<16x1xf32>
    %76 = vector.broadcast %75 : vector<16x1xf32> to vector<16x16xf32>
    %77 = arith.subf %73, %76 : vector<16x16xf32>
    %78 = math.exp %77 : vector<16x16xf32>
    %cst_48 = arith.constant dense<0.000000e+00> : vector<16xf32>
    %79 = vector.multi_reduction <add>, %78, %cst_48 [1] : vector<16x16xf32> to vector<16xf32>
    %80 = vector.shape_cast %79 : vector<16xf32> to vector<16x1xf32>
    %81 = tpu.reciprocal %80 {approx = true} : vector<16x1xf32> -> vector<16x1xf32>
    %82 = vector.broadcast %81 : vector<16x1xf32> to vector<16x16xf32>
    %83 = arith.mulf %78, %82 : vector<16x16xf32>
    %84 = vector.broadcast %19 : f32 to vector<1x16xf32>
    %85 = arith.mulf %84, %5 : vector<1x16xf32>
    %86 = vector.broadcast %21 : f32 to vector<1x16xf32>
    %87 = arith.mulf %86, %46 : vector<1x16xf32>
    %88 = arith.addf %85, %87 : vector<1x16xf32>
    %89 = vector.broadcast %20 : f32 to vector<1x16xf32>
    %90 = arith.mulf %89, %5 : vector<1x16xf32>
    %91 = vector.broadcast %22 : f32 to vector<1x16xf32>
    %92 = arith.mulf %91, %46 : vector<1x16xf32>
    %93 = arith.addf %90, %92 : vector<1x16xf32>
    %94 = vector.broadcast %88 : vector<1x16xf32> to vector<16x16xf32>
    %95 = arith.mulf %83, %94 : vector<16x16xf32>
    %cst_49 = arith.constant dense<0.000000e+00> : vector<16xf32>
    %96 = vector.multi_reduction <add>, %95, %cst_49 [1] : vector<16x16xf32> to vector<16xf32>
    %97 = vector.shape_cast %96 : vector<16xf32> to vector<16x1xf32>
    %98 = vector.broadcast %93 : vector<1x16xf32> to vector<16x16xf32>
    %99 = arith.mulf %83, %98 : vector<16x16xf32>
    %cst_50 = arith.constant dense<0.000000e+00> : vector<16xf32>
    %100 = vector.multi_reduction <add>, %99, %cst_50 [1] : vector<16x16xf32> to vector<16xf32>
    %101 = vector.shape_cast %100 : vector<16xf32> to vector<16x1xf32>
    %102 = vector.broadcast %97 : vector<16x1xf32> to vector<16x128xf32>
    %103 = vector.broadcast %24 : vector<1x128xf32> to vector<16x128xf32>
    %104 = arith.mulf %102, %103 : vector<16x128xf32>
    %105 = vector.broadcast %101 : vector<16x1xf32> to vector<16x128xf32>
    %106 = vector.broadcast %25 : vector<1x128xf32> to vector<16x128xf32>
    %107 = arith.mulf %105, %106 : vector<16x128xf32>
    %108 = arith.addf %104, %107 : vector<16x128xf32>
    %cst_51 = arith.constant dense<0.000000e+00> : vector<16x128xf32>
    %109 = tpu.matmul %34, %9, %cst_51 {dimension_numbers = #tpu.dot_dimension_numbers<[1], [0], [0], [1], [0, 0, 1, 1], [], []>} : vector<16x32xf32>, vector<32x128xf32>, vector<16x128xf32> -> vector<16x128xf32>
    %110 = arith.addf %108, %109 : vector<16x128xf32>
    %111 = vector.broadcast %12 : vector<1x128xf32> to vector<16x128xf32>
    %112 = arith.addf %110, %111 : vector<16x128xf32>
    %113 = arith.negf %112 : vector<16x128xf32>
    %114 = math.exp %113 : vector<16x128xf32>
    %cst_52 = arith.constant 1.000000e+00 : f32
    %115 = vector.broadcast %cst_52 : f32 to vector<16x128xf32>
    %116 = arith.addf %115, %114 : vector<16x128xf32>
    %117 = arith.divf %115, %116 : vector<16x128xf32>
    %cst_53 = arith.constant 2.000000e+00 : f32
    %118 = vector.broadcast %cst_53 : f32 to vector<16x128xf32>
    %119 = arith.mulf %118, %117 : vector<16x128xf32>
    %cst_54 = arith.constant 1.000000e+00 : f32
    %120 = vector.broadcast %cst_54 : f32 to vector<16x128xf32>
    %121 = arith.subf %119, %120 : vector<16x128xf32>
    %122 = arith.select %33, %117, %121 : vector<16x128xi1>, vector<16x128xf32>
    %123 = vector.extract_strided_slice %122 {offsets = [0, 0], sizes = [16, 32], strides = [1, 1]} : vector<16x128xf32> to vector<16x32xf32>
    %124 = vector.extract_strided_slice %122 {offsets = [0, 32], sizes = [16, 32], strides = [1, 1]} : vector<16x128xf32> to vector<16x32xf32>
    %125 = vector.extract_strided_slice %122 {offsets = [0, 64], sizes = [16, 32], strides = [1, 1]} : vector<16x128xf32> to vector<16x32xf32>
    %126 = vector.extract_strided_slice %122 {offsets = [0, 96], sizes = [16, 32], strides = [1, 1]} : vector<16x128xf32> to vector<16x32xf32>
    %127 = arith.mulf %123, %126 : vector<16x32xf32>
    %128 = arith.mulf %124, %35 : vector<16x32xf32>
    %129 = arith.addf %127, %128 : vector<16x32xf32>
    %130 = math.tanh %129 : vector<16x32xf32>
    %131 = arith.mulf %125, %130 : vector<16x32xf32>
    %cst_55 = arith.constant dense<0.000000e+00> : vector<16x128xf32>
    %132 = tpu.matmul %131, %10, %cst_55 {dimension_numbers = #tpu.dot_dimension_numbers<[1], [0], [0], [1], [0, 0, 1, 1], [], []>} : vector<16x32xf32>, vector<32x128xf32>, vector<16x128xf32> -> vector<16x128xf32>
    %cst_56 = arith.constant dense<0.000000e+00> : vector<16x128xf32>
    %133 = tpu.matmul %36, %11, %cst_56 {dimension_numbers = #tpu.dot_dimension_numbers<[1], [0], [0], [1], [0, 0, 1, 1], [], []>} : vector<16x32xf32>, vector<32x128xf32>, vector<16x128xf32> -> vector<16x128xf32>
    %134 = arith.addf %132, %133 : vector<16x128xf32>
    %135 = vector.broadcast %13 : vector<1x128xf32> to vector<16x128xf32>
    %136 = arith.addf %134, %135 : vector<16x128xf32>
    %137 = arith.negf %136 : vector<16x128xf32>
    %138 = math.exp %137 : vector<16x128xf32>
    %cst_57 = arith.constant 1.000000e+00 : f32
    %139 = vector.broadcast %cst_57 : f32 to vector<16x128xf32>
    %140 = arith.addf %139, %138 : vector<16x128xf32>
    %141 = arith.divf %139, %140 : vector<16x128xf32>
    %cst_58 = arith.constant 2.000000e+00 : f32
    %142 = vector.broadcast %cst_58 : f32 to vector<16x128xf32>
    %143 = arith.mulf %142, %141 : vector<16x128xf32>
    %cst_59 = arith.constant 1.000000e+00 : f32
    %144 = vector.broadcast %cst_59 : f32 to vector<16x128xf32>
    %145 = arith.subf %143, %144 : vector<16x128xf32>
    %146 = arith.select %33, %141, %145 : vector<16x128xi1>, vector<16x128xf32>
    %147 = vector.extract_strided_slice %146 {offsets = [0, 0], sizes = [16, 32], strides = [1, 1]} : vector<16x128xf32> to vector<16x32xf32>
    %148 = vector.extract_strided_slice %146 {offsets = [0, 32], sizes = [16, 32], strides = [1, 1]} : vector<16x128xf32> to vector<16x32xf32>
    %149 = vector.extract_strided_slice %146 {offsets = [0, 64], sizes = [16, 32], strides = [1, 1]} : vector<16x128xf32> to vector<16x32xf32>
    %150 = vector.extract_strided_slice %146 {offsets = [0, 96], sizes = [16, 32], strides = [1, 1]} : vector<16x128xf32> to vector<16x32xf32>
    %151 = arith.mulf %147, %150 : vector<16x32xf32>
    %152 = arith.mulf %148, %37 : vector<16x32xf32>
    %153 = arith.addf %151, %152 : vector<16x32xf32>
    %154 = math.tanh %153 : vector<16x32xf32>
    %155 = arith.mulf %149, %154 : vector<16x32xf32>
    %156 = vector.broadcast %14 : vector<1x32xf32> to vector<16x32xf32>
    %157 = arith.mulf %155, %156 : vector<16x32xf32>
    %cst_60 = arith.constant dense<0.000000e+00> : vector<16xf32>
    %158 = vector.multi_reduction <add>, %157, %cst_60 [1] : vector<16x32xf32> to vector<16xf32>
    %159 = vector.shape_cast %158 : vector<16xf32> to vector<16x1xf32>
    %160 = vector.broadcast %23 : f32 to vector<16x1xf32>
    %161 = arith.addf %159, %160 : vector<16x1xf32>
    %162 = vector.broadcast %161 : vector<16x1xf32> to vector<16x16xf32>
    %163 = arith.mulf %30, %162 : vector<16x16xf32>
    %cst_61 = arith.constant dense<0.000000e+00> : vector<16xf32>
    %164 = vector.multi_reduction <add>, %163, %cst_61 [0] : vector<16x16xf32> to vector<16xf32>
    %165 = vector.shape_cast %164 : vector<16xf32> to vector<1x16xf32>
    %166 = arith.subf %7, %161 : vector<16x1xf32>
    %167 = arith.subf %5, %165 : vector<1x16xf32>
    %168 = vector.broadcast %167 : vector<1x16xf32> to vector<16x16xf32>
    %169 = arith.mulf %1, %168 : vector<16x16xf32>
    %cst_62 = arith.constant dense<0.000000e+00> : vector<16xf32>
    %170 = vector.multi_reduction <add>, %169, %cst_62 [1] : vector<16x16xf32> to vector<16xf32>
    %171 = vector.shape_cast %170 : vector<16xf32> to vector<16x1xf32>
    %172 = arith.subf %171, %3 : vector<16x1xf32>
    %173 = arith.mulf %172, %172 : vector<16x1xf32>
    %cst_63 = arith.constant dense<0.000000e+00> : vector<1xf32>
    %174 = vector.multi_reduction <add>, %173, %cst_63 [0] : vector<16x1xf32> to vector<1xf32>
    %175 = vector.shape_cast %174 : vector<1xf32> to vector<1x1xf32>
    %176 = vector.broadcast %172 : vector<16x1xf32> to vector<16x16xf32>
    %177 = arith.mulf %1, %176 : vector<16x16xf32>
    %cst_64 = arith.constant dense<0.000000e+00> : vector<16xf32>
    %178 = vector.multi_reduction <add>, %177, %cst_64 [0] : vector<16x16xf32> to vector<16xf32>
    %179 = vector.shape_cast %178 : vector<16xf32> to vector<1x16xf32>
    %180 = vector.broadcast %179 : vector<1x16xf32> to vector<16x16xf32>
    %181 = arith.mulf %30, %180 : vector<16x16xf32>
    %cst_65 = arith.constant dense<0.000000e+00> : vector<16xf32>
    %182 = vector.multi_reduction <add>, %181, %cst_65 [1] : vector<16x16xf32> to vector<16xf32>
    %183 = vector.shape_cast %182 : vector<16xf32> to vector<16x1xf32>
    %184 = vector.broadcast %166 : vector<16x1xf32> to vector<16x16xf32>
    %185 = vector.broadcast %167 : vector<1x16xf32> to vector<16x16xf32>
    %186 = arith.mulf %184, %185 : vector<16x16xf32>
    %187 = vector.broadcast %15 : f32 to vector<16x16xf32>
    %188 = arith.mulf %187, %186 : vector<16x16xf32>
    %189 = vector.broadcast %166 : vector<16x1xf32> to vector<16x16xf32>
    %190 = vector.broadcast %179 : vector<1x16xf32> to vector<16x16xf32>
    %191 = arith.mulf %189, %190 : vector<16x16xf32>
    %192 = vector.broadcast %16 : f32 to vector<16x16xf32>
    %193 = arith.mulf %192, %191 : vector<16x16xf32>
    %194 = arith.addf %188, %193 : vector<16x16xf32>
    %195 = vector.broadcast %183 : vector<16x1xf32> to vector<16x16xf32>
    %196 = vector.broadcast %167 : vector<1x16xf32> to vector<16x16xf32>
    %197 = arith.mulf %195, %196 : vector<16x16xf32>
    %198 = vector.broadcast %17 : f32 to vector<16x16xf32>
    %199 = arith.mulf %198, %197 : vector<16x16xf32>
    %200 = arith.addf %194, %199 : vector<16x16xf32>
    %201 = vector.broadcast %183 : vector<16x1xf32> to vector<16x16xf32>
    %202 = vector.broadcast %179 : vector<1x16xf32> to vector<16x16xf32>
    %203 = arith.mulf %201, %202 : vector<16x16xf32>
    %204 = vector.broadcast %18 : f32 to vector<16x16xf32>
    %205 = arith.mulf %204, %203 : vector<16x16xf32>
    %206 = arith.addf %200, %205 : vector<16x16xf32>
    %cst_66 = arith.constant dense<0xFF800000> : vector<16xf32>
    %207 = vector.multi_reduction <maximumf>, %206, %cst_66 [1] : vector<16x16xf32> to vector<16xf32>
    %208 = vector.shape_cast %207 : vector<16xf32> to vector<16x1xf32>
    %209 = vector.broadcast %208 : vector<16x1xf32> to vector<16x16xf32>
    %210 = arith.subf %206, %209 : vector<16x16xf32>
    %211 = math.exp %210 : vector<16x16xf32>
    %cst_67 = arith.constant dense<0.000000e+00> : vector<16xf32>
    %212 = vector.multi_reduction <add>, %211, %cst_67 [1] : vector<16x16xf32> to vector<16xf32>
    %213 = vector.shape_cast %212 : vector<16xf32> to vector<16x1xf32>
    %214 = tpu.reciprocal %213 {approx = true} : vector<16x1xf32> -> vector<16x1xf32>
    %215 = vector.broadcast %214 : vector<16x1xf32> to vector<16x16xf32>
    %216 = arith.mulf %211, %215 : vector<16x16xf32>
    %217 = vector.broadcast %19 : f32 to vector<1x16xf32>
    %218 = arith.mulf %217, %167 : vector<1x16xf32>
    %219 = vector.broadcast %21 : f32 to vector<1x16xf32>
    %220 = arith.mulf %219, %179 : vector<1x16xf32>
    %221 = arith.addf %218, %220 : vector<1x16xf32>
    %222 = vector.broadcast %20 : f32 to vector<1x16xf32>
    %223 = arith.mulf %222, %167 : vector<1x16xf32>
    %224 = vector.broadcast %22 : f32 to vector<1x16xf32>
    %225 = arith.mulf %224, %179 : vector<1x16xf32>
    %226 = arith.addf %223, %225 : vector<1x16xf32>
    %227 = vector.broadcast %221 : vector<1x16xf32> to vector<16x16xf32>
    %228 = arith.mulf %216, %227 : vector<16x16xf32>
    %cst_68 = arith.constant dense<0.000000e+00> : vector<16xf32>
    %229 = vector.multi_reduction <add>, %228, %cst_68 [1] : vector<16x16xf32> to vector<16xf32>
    %230 = vector.shape_cast %229 : vector<16xf32> to vector<16x1xf32>
    %231 = vector.broadcast %226 : vector<1x16xf32> to vector<16x16xf32>
    %232 = arith.mulf %216, %231 : vector<16x16xf32>
    %cst_69 = arith.constant dense<0.000000e+00> : vector<16xf32>
    %233 = vector.multi_reduction <add>, %232, %cst_69 [1] : vector<16x16xf32> to vector<16xf32>
    %234 = vector.shape_cast %233 : vector<16xf32> to vector<16x1xf32>
    %235 = vector.broadcast %230 : vector<16x1xf32> to vector<16x128xf32>
    %236 = vector.broadcast %24 : vector<1x128xf32> to vector<16x128xf32>
    %237 = arith.mulf %235, %236 : vector<16x128xf32>
    %238 = vector.broadcast %234 : vector<16x1xf32> to vector<16x128xf32>
    %239 = vector.broadcast %25 : vector<1x128xf32> to vector<16x128xf32>
    %240 = arith.mulf %238, %239 : vector<16x128xf32>
    %241 = arith.addf %237, %240 : vector<16x128xf32>
    %cst_70 = arith.constant dense<0.000000e+00> : vector<16x128xf32>
    %242 = tpu.matmul %131, %9, %cst_70 {dimension_numbers = #tpu.dot_dimension_numbers<[1], [0], [0], [1], [0, 0, 1, 1], [], []>} : vector<16x32xf32>, vector<32x128xf32>, vector<16x128xf32> -> vector<16x128xf32>
    %243 = arith.addf %241, %242 : vector<16x128xf32>
    %244 = vector.broadcast %12 : vector<1x128xf32> to vector<16x128xf32>
    %245 = arith.addf %243, %244 : vector<16x128xf32>
    %246 = arith.negf %245 : vector<16x128xf32>
    %247 = math.exp %246 : vector<16x128xf32>
    %cst_71 = arith.constant 1.000000e+00 : f32
    %248 = vector.broadcast %cst_71 : f32 to vector<16x128xf32>
    %249 = arith.addf %248, %247 : vector<16x128xf32>
    %250 = arith.divf %248, %249 : vector<16x128xf32>
    %cst_72 = arith.constant 2.000000e+00 : f32
    %251 = vector.broadcast %cst_72 : f32 to vector<16x128xf32>
    %252 = arith.mulf %251, %250 : vector<16x128xf32>
    %cst_73 = arith.constant 1.000000e+00 : f32
    %253 = vector.broadcast %cst_73 : f32 to vector<16x128xf32>
    %254 = arith.subf %252, %253 : vector<16x128xf32>
    %255 = arith.select %33, %250, %254 : vector<16x128xi1>, vector<16x128xf32>
    %256 = vector.extract_strided_slice %255 {offsets = [0, 0], sizes = [16, 32], strides = [1, 1]} : vector<16x128xf32> to vector<16x32xf32>
    %257 = vector.extract_strided_slice %255 {offsets = [0, 32], sizes = [16, 32], strides = [1, 1]} : vector<16x128xf32> to vector<16x32xf32>
    %258 = vector.extract_strided_slice %255 {offsets = [0, 64], sizes = [16, 32], strides = [1, 1]} : vector<16x128xf32> to vector<16x32xf32>
    %259 = vector.extract_strided_slice %255 {offsets = [0, 96], sizes = [16, 32], strides = [1, 1]} : vector<16x128xf32> to vector<16x32xf32>
    %260 = arith.mulf %256, %259 : vector<16x32xf32>
    %261 = arith.mulf %257, %129 : vector<16x32xf32>
    %262 = arith.addf %260, %261 : vector<16x32xf32>
    %263 = math.tanh %262 : vector<16x32xf32>
    %264 = arith.mulf %258, %263 : vector<16x32xf32>
    %cst_74 = arith.constant dense<0.000000e+00> : vector<16x128xf32>
    %265 = tpu.matmul %264, %10, %cst_74 {dimension_numbers = #tpu.dot_dimension_numbers<[1], [0], [0], [1], [0, 0, 1, 1], [], []>} : vector<16x32xf32>, vector<32x128xf32>, vector<16x128xf32> -> vector<16x128xf32>
    %cst_75 = arith.constant dense<0.000000e+00> : vector<16x128xf32>
    %266 = tpu.matmul %155, %11, %cst_75 {dimension_numbers = #tpu.dot_dimension_numbers<[1], [0], [0], [1], [0, 0, 1, 1], [], []>} : vector<16x32xf32>, vector<32x128xf32>, vector<16x128xf32> -> vector<16x128xf32>
    %267 = arith.addf %265, %266 : vector<16x128xf32>
    %268 = vector.broadcast %13 : vector<1x128xf32> to vector<16x128xf32>
    %269 = arith.addf %267, %268 : vector<16x128xf32>
    %270 = arith.negf %269 : vector<16x128xf32>
    %271 = math.exp %270 : vector<16x128xf32>
    %cst_76 = arith.constant 1.000000e+00 : f32
    %272 = vector.broadcast %cst_76 : f32 to vector<16x128xf32>
    %273 = arith.addf %272, %271 : vector<16x128xf32>
    %274 = arith.divf %272, %273 : vector<16x128xf32>
    %cst_77 = arith.constant 2.000000e+00 : f32
    %275 = vector.broadcast %cst_77 : f32 to vector<16x128xf32>
    %276 = arith.mulf %275, %274 : vector<16x128xf32>
    %cst_78 = arith.constant 1.000000e+00 : f32
    %277 = vector.broadcast %cst_78 : f32 to vector<16x128xf32>
    %278 = arith.subf %276, %277 : vector<16x128xf32>
    %279 = arith.select %33, %274, %278 : vector<16x128xi1>, vector<16x128xf32>
    %280 = vector.extract_strided_slice %279 {offsets = [0, 0], sizes = [16, 32], strides = [1, 1]} : vector<16x128xf32> to vector<16x32xf32>
    %281 = vector.extract_strided_slice %279 {offsets = [0, 32], sizes = [16, 32], strides = [1, 1]} : vector<16x128xf32> to vector<16x32xf32>
    %282 = vector.extract_strided_slice %279 {offsets = [0, 64], sizes = [16, 32], strides = [1, 1]} : vector<16x128xf32> to vector<16x32xf32>
    %283 = vector.extract_strided_slice %279 {offsets = [0, 96], sizes = [16, 32], strides = [1, 1]} : vector<16x128xf32> to vector<16x32xf32>
    %284 = arith.mulf %280, %283 : vector<16x32xf32>
    %285 = arith.mulf %281, %153 : vector<16x32xf32>
    %286 = arith.addf %284, %285 : vector<16x32xf32>
    %287 = math.tanh %286 : vector<16x32xf32>
    %288 = arith.mulf %282, %287 : vector<16x32xf32>
    %289 = vector.broadcast %14 : vector<1x32xf32> to vector<16x32xf32>
    %290 = arith.mulf %288, %289 : vector<16x32xf32>
    %cst_79 = arith.constant dense<0.000000e+00> : vector<16xf32>
    %291 = vector.multi_reduction <add>, %290, %cst_79 [1] : vector<16x32xf32> to vector<16xf32>
    %292 = vector.shape_cast %291 : vector<16xf32> to vector<16x1xf32>
    %293 = vector.broadcast %23 : f32 to vector<16x1xf32>
    %294 = arith.addf %292, %293 : vector<16x1xf32>
    %295 = vector.broadcast %294 : vector<16x1xf32> to vector<16x16xf32>
    %296 = arith.mulf %30, %295 : vector<16x16xf32>
    %cst_80 = arith.constant dense<0.000000e+00> : vector<16xf32>
    %297 = vector.multi_reduction <add>, %296, %cst_80 [0] : vector<16x16xf32> to vector<16xf32>
    %298 = vector.shape_cast %297 : vector<16xf32> to vector<1x16xf32>
    %299 = arith.subf %166, %294 : vector<16x1xf32>
    %300 = arith.subf %167, %298 : vector<1x16xf32>
    %301 = vector.broadcast %300 : vector<1x16xf32> to vector<16x16xf32>
    %302 = arith.mulf %1, %301 : vector<16x16xf32>
    %cst_81 = arith.constant dense<0.000000e+00> : vector<16xf32>
    %303 = vector.multi_reduction <add>, %302, %cst_81 [1] : vector<16x16xf32> to vector<16xf32>
    %304 = vector.shape_cast %303 : vector<16xf32> to vector<16x1xf32>
    %305 = arith.subf %304, %3 : vector<16x1xf32>
    %306 = arith.mulf %305, %305 : vector<16x1xf32>
    %cst_82 = arith.constant dense<0.000000e+00> : vector<1xf32>
    %307 = vector.multi_reduction <add>, %306, %cst_82 [0] : vector<16x1xf32> to vector<1xf32>
    %308 = vector.shape_cast %307 : vector<1xf32> to vector<1x1xf32>
    %309 = vector.broadcast %305 : vector<16x1xf32> to vector<16x16xf32>
    %310 = arith.mulf %1, %309 : vector<16x16xf32>
    %cst_83 = arith.constant dense<0.000000e+00> : vector<16xf32>
    %311 = vector.multi_reduction <add>, %310, %cst_83 [0] : vector<16x16xf32> to vector<16xf32>
    %312 = vector.shape_cast %311 : vector<16xf32> to vector<1x16xf32>
    %313 = vector.broadcast %312 : vector<1x16xf32> to vector<16x16xf32>
    %314 = arith.mulf %30, %313 : vector<16x16xf32>
    %cst_84 = arith.constant dense<0.000000e+00> : vector<16xf32>
    %315 = vector.multi_reduction <add>, %314, %cst_84 [1] : vector<16x16xf32> to vector<16xf32>
    %316 = vector.shape_cast %315 : vector<16xf32> to vector<16x1xf32>
    %317 = vector.broadcast %299 : vector<16x1xf32> to vector<16x16xf32>
    %318 = vector.broadcast %300 : vector<1x16xf32> to vector<16x16xf32>
    %319 = arith.mulf %317, %318 : vector<16x16xf32>
    %320 = vector.broadcast %15 : f32 to vector<16x16xf32>
    %321 = arith.mulf %320, %319 : vector<16x16xf32>
    %322 = vector.broadcast %299 : vector<16x1xf32> to vector<16x16xf32>
    %323 = vector.broadcast %312 : vector<1x16xf32> to vector<16x16xf32>
    %324 = arith.mulf %322, %323 : vector<16x16xf32>
    %325 = vector.broadcast %16 : f32 to vector<16x16xf32>
    %326 = arith.mulf %325, %324 : vector<16x16xf32>
    %327 = arith.addf %321, %326 : vector<16x16xf32>
    %328 = vector.broadcast %316 : vector<16x1xf32> to vector<16x16xf32>
    %329 = vector.broadcast %300 : vector<1x16xf32> to vector<16x16xf32>
    %330 = arith.mulf %328, %329 : vector<16x16xf32>
    %331 = vector.broadcast %17 : f32 to vector<16x16xf32>
    %332 = arith.mulf %331, %330 : vector<16x16xf32>
    %333 = arith.addf %327, %332 : vector<16x16xf32>
    %334 = vector.broadcast %316 : vector<16x1xf32> to vector<16x16xf32>
    %335 = vector.broadcast %312 : vector<1x16xf32> to vector<16x16xf32>
    %336 = arith.mulf %334, %335 : vector<16x16xf32>
    %337 = vector.broadcast %18 : f32 to vector<16x16xf32>
    %338 = arith.mulf %337, %336 : vector<16x16xf32>
    %339 = arith.addf %333, %338 : vector<16x16xf32>
    %cst_85 = arith.constant dense<0xFF800000> : vector<16xf32>
    %340 = vector.multi_reduction <maximumf>, %339, %cst_85 [1] : vector<16x16xf32> to vector<16xf32>
    %341 = vector.shape_cast %340 : vector<16xf32> to vector<16x1xf32>
    %342 = vector.broadcast %341 : vector<16x1xf32> to vector<16x16xf32>
    %343 = arith.subf %339, %342 : vector<16x16xf32>
    %344 = math.exp %343 : vector<16x16xf32>
    %cst_86 = arith.constant dense<0.000000e+00> : vector<16xf32>
    %345 = vector.multi_reduction <add>, %344, %cst_86 [1] : vector<16x16xf32> to vector<16xf32>
    %346 = vector.shape_cast %345 : vector<16xf32> to vector<16x1xf32>
    %347 = tpu.reciprocal %346 {approx = true} : vector<16x1xf32> -> vector<16x1xf32>
    %348 = vector.broadcast %347 : vector<16x1xf32> to vector<16x16xf32>
    %349 = arith.mulf %344, %348 : vector<16x16xf32>
    %350 = vector.broadcast %19 : f32 to vector<1x16xf32>
    %351 = arith.mulf %350, %300 : vector<1x16xf32>
    %352 = vector.broadcast %21 : f32 to vector<1x16xf32>
    %353 = arith.mulf %352, %312 : vector<1x16xf32>
    %354 = arith.addf %351, %353 : vector<1x16xf32>
    %355 = vector.broadcast %20 : f32 to vector<1x16xf32>
    %356 = arith.mulf %355, %300 : vector<1x16xf32>
    %357 = vector.broadcast %22 : f32 to vector<1x16xf32>
    %358 = arith.mulf %357, %312 : vector<1x16xf32>
    %359 = arith.addf %356, %358 : vector<1x16xf32>
    %360 = vector.broadcast %354 : vector<1x16xf32> to vector<16x16xf32>
    %361 = arith.mulf %349, %360 : vector<16x16xf32>
    %cst_87 = arith.constant dense<0.000000e+00> : vector<16xf32>
    %362 = vector.multi_reduction <add>, %361, %cst_87 [1] : vector<16x16xf32> to vector<16xf32>
    %363 = vector.shape_cast %362 : vector<16xf32> to vector<16x1xf32>
    %364 = vector.broadcast %359 : vector<1x16xf32> to vector<16x16xf32>
    %365 = arith.mulf %349, %364 : vector<16x16xf32>
    %cst_88 = arith.constant dense<0.000000e+00> : vector<16xf32>
    %366 = vector.multi_reduction <add>, %365, %cst_88 [1] : vector<16x16xf32> to vector<16xf32>
    %367 = vector.shape_cast %366 : vector<16xf32> to vector<16x1xf32>
    %368 = vector.broadcast %363 : vector<16x1xf32> to vector<16x128xf32>
    %369 = vector.broadcast %24 : vector<1x128xf32> to vector<16x128xf32>
    %370 = arith.mulf %368, %369 : vector<16x128xf32>
    %371 = vector.broadcast %367 : vector<16x1xf32> to vector<16x128xf32>
    %372 = vector.broadcast %25 : vector<1x128xf32> to vector<16x128xf32>
    %373 = arith.mulf %371, %372 : vector<16x128xf32>
    %374 = arith.addf %370, %373 : vector<16x128xf32>
    %cst_89 = arith.constant dense<0.000000e+00> : vector<16x128xf32>
    %375 = tpu.matmul %264, %9, %cst_89 {dimension_numbers = #tpu.dot_dimension_numbers<[1], [0], [0], [1], [0, 0, 1, 1], [], []>} : vector<16x32xf32>, vector<32x128xf32>, vector<16x128xf32> -> vector<16x128xf32>
    %376 = arith.addf %374, %375 : vector<16x128xf32>
    %377 = vector.broadcast %12 : vector<1x128xf32> to vector<16x128xf32>
    %378 = arith.addf %376, %377 : vector<16x128xf32>
    %379 = arith.negf %378 : vector<16x128xf32>
    %380 = math.exp %379 : vector<16x128xf32>
    %cst_90 = arith.constant 1.000000e+00 : f32
    %381 = vector.broadcast %cst_90 : f32 to vector<16x128xf32>
    %382 = arith.addf %381, %380 : vector<16x128xf32>
    %383 = arith.divf %381, %382 : vector<16x128xf32>
    %cst_91 = arith.constant 2.000000e+00 : f32
    %384 = vector.broadcast %cst_91 : f32 to vector<16x128xf32>
    %385 = arith.mulf %384, %383 : vector<16x128xf32>
    %cst_92 = arith.constant 1.000000e+00 : f32
    %386 = vector.broadcast %cst_92 : f32 to vector<16x128xf32>
    %387 = arith.subf %385, %386 : vector<16x128xf32>
    %388 = arith.select %33, %383, %387 : vector<16x128xi1>, vector<16x128xf32>
    %389 = vector.extract_strided_slice %388 {offsets = [0, 0], sizes = [16, 32], strides = [1, 1]} : vector<16x128xf32> to vector<16x32xf32>
    %390 = vector.extract_strided_slice %388 {offsets = [0, 32], sizes = [16, 32], strides = [1, 1]} : vector<16x128xf32> to vector<16x32xf32>
    %391 = vector.extract_strided_slice %388 {offsets = [0, 64], sizes = [16, 32], strides = [1, 1]} : vector<16x128xf32> to vector<16x32xf32>
    %392 = vector.extract_strided_slice %388 {offsets = [0, 96], sizes = [16, 32], strides = [1, 1]} : vector<16x128xf32> to vector<16x32xf32>
    %393 = arith.mulf %389, %392 : vector<16x32xf32>
    %394 = arith.mulf %390, %262 : vector<16x32xf32>
    %395 = arith.addf %393, %394 : vector<16x32xf32>
    %396 = math.tanh %395 : vector<16x32xf32>
    %397 = arith.mulf %391, %396 : vector<16x32xf32>
    %cst_93 = arith.constant dense<0.000000e+00> : vector<16x128xf32>
    %398 = tpu.matmul %397, %10, %cst_93 {dimension_numbers = #tpu.dot_dimension_numbers<[1], [0], [0], [1], [0, 0, 1, 1], [], []>} : vector<16x32xf32>, vector<32x128xf32>, vector<16x128xf32> -> vector<16x128xf32>
    %cst_94 = arith.constant dense<0.000000e+00> : vector<16x128xf32>
    %399 = tpu.matmul %288, %11, %cst_94 {dimension_numbers = #tpu.dot_dimension_numbers<[1], [0], [0], [1], [0, 0, 1, 1], [], []>} : vector<16x32xf32>, vector<32x128xf32>, vector<16x128xf32> -> vector<16x128xf32>
    %400 = arith.addf %398, %399 : vector<16x128xf32>
    %401 = vector.broadcast %13 : vector<1x128xf32> to vector<16x128xf32>
    %402 = arith.addf %400, %401 : vector<16x128xf32>
    %403 = arith.negf %402 : vector<16x128xf32>
    %404 = math.exp %403 : vector<16x128xf32>
    %cst_95 = arith.constant 1.000000e+00 : f32
    %405 = vector.broadcast %cst_95 : f32 to vector<16x128xf32>
    %406 = arith.addf %405, %404 : vector<16x128xf32>
    %407 = arith.divf %405, %406 : vector<16x128xf32>
    %cst_96 = arith.constant 2.000000e+00 : f32
    %408 = vector.broadcast %cst_96 : f32 to vector<16x128xf32>
    %409 = arith.mulf %408, %407 : vector<16x128xf32>
    %cst_97 = arith.constant 1.000000e+00 : f32
    %410 = vector.broadcast %cst_97 : f32 to vector<16x128xf32>
    %411 = arith.subf %409, %410 : vector<16x128xf32>
    %412 = arith.select %33, %407, %411 : vector<16x128xi1>, vector<16x128xf32>
    %413 = vector.extract_strided_slice %412 {offsets = [0, 0], sizes = [16, 32], strides = [1, 1]} : vector<16x128xf32> to vector<16x32xf32>
    %414 = vector.extract_strided_slice %412 {offsets = [0, 32], sizes = [16, 32], strides = [1, 1]} : vector<16x128xf32> to vector<16x32xf32>
    %415 = vector.extract_strided_slice %412 {offsets = [0, 64], sizes = [16, 32], strides = [1, 1]} : vector<16x128xf32> to vector<16x32xf32>
    %416 = vector.extract_strided_slice %412 {offsets = [0, 96], sizes = [16, 32], strides = [1, 1]} : vector<16x128xf32> to vector<16x32xf32>
    %417 = arith.mulf %413, %416 : vector<16x32xf32>
    %418 = arith.mulf %414, %286 : vector<16x32xf32>
    %419 = arith.addf %417, %418 : vector<16x32xf32>
    %420 = math.tanh %419 : vector<16x32xf32>
    %421 = arith.mulf %415, %420 : vector<16x32xf32>
    %422 = vector.broadcast %14 : vector<1x32xf32> to vector<16x32xf32>
    %423 = arith.mulf %421, %422 : vector<16x32xf32>
    %cst_98 = arith.constant dense<0.000000e+00> : vector<16xf32>
    %424 = vector.multi_reduction <add>, %423, %cst_98 [1] : vector<16x32xf32> to vector<16xf32>
    %425 = vector.shape_cast %424 : vector<16xf32> to vector<16x1xf32>
    %426 = vector.broadcast %23 : f32 to vector<16x1xf32>
    %427 = arith.addf %425, %426 : vector<16x1xf32>
    %428 = vector.broadcast %427 : vector<16x1xf32> to vector<16x16xf32>
    %429 = arith.mulf %30, %428 : vector<16x16xf32>
    %cst_99 = arith.constant dense<0.000000e+00> : vector<16xf32>
    %430 = vector.multi_reduction <add>, %429, %cst_99 [0] : vector<16x16xf32> to vector<16xf32>
    %431 = vector.shape_cast %430 : vector<16xf32> to vector<1x16xf32>
    %432 = arith.subf %300, %431 : vector<1x16xf32>
    %433 = vector.broadcast %432 : vector<1x16xf32> to vector<16x16xf32>
    %434 = arith.mulf %1, %433 : vector<16x16xf32>
    %cst_100 = arith.constant dense<0.000000e+00> : vector<16xf32>
    %435 = vector.multi_reduction <add>, %434, %cst_100 [1] : vector<16x16xf32> to vector<16xf32>
    %436 = vector.shape_cast %435 : vector<16xf32> to vector<16x1xf32>
    %437 = arith.subf %436, %3 : vector<16x1xf32>
    %438 = arith.mulf %437, %437 : vector<16x1xf32>
    %cst_101 = arith.constant dense<0.000000e+00> : vector<1xf32>
    %439 = vector.multi_reduction <add>, %438, %cst_101 [0] : vector<16x1xf32> to vector<1xf32>
    %440 = vector.shape_cast %439 : vector<1xf32> to vector<1x1xf32>
    %441 = tpu.concatenate %167, %300, %432 in 0 : vector<1x16xf32>, vector<1x16xf32>, vector<1x16xf32> -> vector<3x16xf32>
    %c0_102 = arith.constant 0 : index
    %c0_103 = arith.constant 0 : index
    %c0_104 = arith.constant 0 : index
    %442 = vector.load %arg15[%c0_102, %c0_103, %c0_104] : memref<1x3x16xf32, #tpu.memory_space<vmem>>, vector<1x3x16xf32>
    %443 = vector.shape_cast %442 : vector<1x3x16xf32> to vector<3x16xf32>
    %444 = vector.shape_cast %441 : vector<3x16xf32> to vector<1x3x16xf32>
    tpu.vector_store %arg15[%c0_102, %c0_103, %c0_104], %444 {strides = array<i32>} : memref<1x3x16xf32, #tpu.memory_space<vmem>>, vector<1x3x16xf32>,
    %445 = tpu.concatenate %175, %308, %440 in 1 : vector<1x1xf32>, vector<1x1xf32>, vector<1x1xf32> -> vector<1x3xf32>
    %c0_105 = arith.constant 0 : index
    %c0_106 = arith.constant 0 : index
    %c0_107 = arith.constant 0 : index
    %446 = vector.load %arg16[%c0_105, %c0_106, %c0_107] : memref<1x1x3xf32, #tpu.memory_space<vmem>>, vector<1x1x3xf32>
    %447 = vector.shape_cast %446 : vector<1x1x3xf32> to vector<1x3xf32>
    %448 = vector.shape_cast %445 : vector<1x3xf32> to vector<1x1x3xf32>
    tpu.vector_store %arg16[%c0_105, %c0_106, %c0_107], %448 {strides = array<i32>} : memref<1x1x3xf32, #tpu.memory_space<vmem>>, vector<1x1x3xf32>,
    return
  }
  func.func @transform_0(%arg0: i32) -> (i32, i32, i32) {
    %c0_i32 = arith.constant 0 : i32
    %c0_i32_0 = arith.constant 0 : i32
    %c0_i32_1 = arith.constant 0 : i32
    return %arg0, %c0_i32, %c0_i32_0 : i32, i32, i32
  }
  func.func @transform_1(%arg0: i32) -> (i32, i32, i32) {
    %c0_i32 = arith.constant 0 : i32
    %c0_i32_0 = arith.constant 0 : i32
    %c0_i32_1 = arith.constant 0 : i32
    return %arg0, %c0_i32, %c0_i32_0 : i32, i32, i32
  }
  func.func @transform_2(%arg0: i32) -> (i32, i32, i32) {
    %c0_i32 = arith.constant 0 : i32
    %c0_i32_0 = arith.constant 0 : i32
    %c0_i32_1 = arith.constant 0 : i32
    return %arg0, %c0_i32, %c0_i32_0 : i32, i32, i32
  }
  func.func @transform_3(%arg0: i32) -> (i32, i32, i32) {
    %c0_i32 = arith.constant 0 : i32
    %c0_i32_0 = arith.constant 0 : i32
    %c0_i32_1 = arith.constant 0 : i32
    return %arg0, %c0_i32, %c0_i32_0 : i32, i32, i32
  }
  func.func @transform_4(%arg0: i32) -> (i32, i32) {
    %c0_i32 = arith.constant 0 : i32
    %c0_i32_0 = arith.constant 0 : i32
    %c0_i32_1 = arith.constant 0 : i32
    return %c0_i32, %c0_i32_0 : i32, i32
  }
  func.func @transform_5(%arg0: i32) -> (i32, i32) {
    %c0_i32 = arith.constant 0 : i32
    %c0_i32_0 = arith.constant 0 : i32
    %c0_i32_1 = arith.constant 0 : i32
    return %c0_i32, %c0_i32_0 : i32, i32
  }
  func.func @transform_6(%arg0: i32) -> (i32, i32) {
    %c0_i32 = arith.constant 0 : i32
    %c0_i32_0 = arith.constant 0 : i32
    %c0_i32_1 = arith.constant 0 : i32
    return %c0_i32, %c0_i32_0 : i32, i32
  }
  func.func @transform_7(%arg0: i32) -> (i32, i32) {
    %c0_i32 = arith.constant 0 : i32
    %c0_i32_0 = arith.constant 0 : i32
    %c0_i32_1 = arith.constant 0 : i32
    return %c0_i32, %c0_i32_0 : i32, i32
  }
  func.func @transform_8(%arg0: i32) -> (i32, i32) {
    %c0_i32 = arith.constant 0 : i32
    %c0_i32_0 = arith.constant 0 : i32
    %c0_i32_1 = arith.constant 0 : i32
    return %c0_i32, %c0_i32_0 : i32, i32
  }
  func.func @transform_9(%arg0: i32) -> (i32, i32) {
    %c0_i32 = arith.constant 0 : i32
    %c0_i32_0 = arith.constant 0 : i32
    %c0_i32_1 = arith.constant 0 : i32
    return %c0_i32, %c0_i32_0 : i32, i32
  }
  func.func @transform_10(%arg0: i32) -> (i32, i32) {
    %c0_i32 = arith.constant 0 : i32
    %c0_i32_0 = arith.constant 0 : i32
    %c0_i32_1 = arith.constant 0 : i32
    return %c0_i32, %c0_i32_0 : i32, i32
  }
  func.func @transform_11(%arg0: i32) -> (i32, i32) {
    %c0_i32 = arith.constant 0 : i32
    %c0_i32_0 = arith.constant 0 : i32
    %c0_i32_1 = arith.constant 0 : i32
    return %c0_i32, %c0_i32_0 : i32, i32
  }
  func.func @transform_12(%arg0: i32) -> (i32, i32) {
    %c0_i32 = arith.constant 0 : i32
    %c0_i32_0 = arith.constant 0 : i32
    %c0_i32_1 = arith.constant 0 : i32
    return %c0_i32, %c0_i32_0 : i32, i32
  }
  func.func @transform_13(%arg0: i32) -> i32 {
    %c0_i32 = arith.constant 0 : i32
    %c0_i32_0 = arith.constant 0 : i32
    return %c0_i32 : i32
  }
  func.func @transform_14(%arg0: i32) -> (i32, i32, i32) {
    %c0_i32 = arith.constant 0 : i32
    %c0_i32_0 = arith.constant 0 : i32
    %c0_i32_1 = arith.constant 0 : i32
    return %arg0, %c0_i32, %c0_i32_0 : i32, i32, i32
  }
  func.func @transform_15(%arg0: i32) -> (i32, i32, i32) {
    %c0_i32 = arith.constant 0 : i32
    %c0_i32_0 = arith.constant 0 : i32
    %c0_i32_1 = arith.constant 0 : i32
    return %arg0, %c0_i32, %c0_i32_0 : i32, i32, i32
  }
}

</mosaic_0001>

<bundles_post_ra>
// kernel: lstm_forward.1
= control target key start
LH: loop header
LB: loop body
LE: loop exit
PB: predicated region body
PF: predicated region fallthrough
CT: control target
= control target key end

     0   :  { %s3223_s0 = inlined_call_operand.vmem [shape: f32[2,16,16], index: 0, kind: input, shape index: {}]   ;;  %s3224_s1 = inlined_call_operand.vmem [shape: f32[2,16,1], index: 1, kind: input, shape index: {}]   ;;  %s3225_s2 = inlined_call_operand.vmem [shape: f32[2,1,16], index: 2, kind: input, shape index: {}]   ;;  %s3226_s3 = inlined_call_operand.vmem [shape: f32[2,16,1], index: 3, kind: input, shape index: {}]   ;;  %s3227_s4 = inlined_call_operand.vmem [shape: f32[2,128], index: 4, kind: input, shape index: {}]   ;;  %s3228_s5 = inlined_call_operand.vmem [shape: f32[32,128], index: 5, kind: input, shape index: {}]   ;;  %s3229_s6 = inlined_call_operand.hbm [shape: f32[32,128], index: 6, kind: input, shape index: {}]   ;;  %s3230_s7 = inlined_call_operand.hbm [shape: f32[32,128], index: 7, kind: input, shape index: {}]   ;;  %s3231_s8 = inlined_call_operand.vmem [shape: f32[1,128], index: 8, kind: input, shape index: {}]   ;;  %s3232_s9 = inlined_call_operand.vmem [shape: f32[1,128], index: 9, kind: input, shape index: {}]   ;;  %s3233_s10 = inlined_call_operand.vmem [shape: f32[1,32], index: 10, kind: input, shape index: {}]   ;;  %s3234_s11 = inlined_call_operand.hbm [shape: f32[2,2], index: 11, kind: input, shape index: {}]   ;;  %s3235_s12 = inlined_call_operand.vmem [shape: f32[2,2], index: 12, kind: input, shape index: {}]   ;;  %s3236_s13 = inlined_call_operand.<no memory space> [shape: f32[1], index: 13, kind: input, shape index: {}]   ;;  %s3237_s14 = inlined_call_operand.vmem [shape: f32[2,3,16], index: 14, kind: output, shape index: {0}]   ;;  %s3238_s15 = inlined_call_operand.vmem [shape: f32[2,1,3], index: 15, kind: output, shape index: {1}]  }
   0x1   :  { %3239 = sst [smem:[#allocation15_spill]] %s3229_s6 }
   0x2   :  { %3240 = sst [smem:[#allocation16_spill]] %s3230_s7 }
   0x3   :  { %21 = sst [smem:[#allocation2]] %s3236_s13 }
   0x4   :  { %22 = vsyncpa [#allocation4], 0 }
   0x5   :  { %23 = vsyncpa [#allocation8], 0 }
   0x6   :  { %24 = vsyncpa [#allocation5], 0 }
   0x7   :  { %25 = vsyncpa [#allocation6], 0  ;;  %s2623_s20 = smov 0  }
   0x8 LB: > { %s3241_s6 = sld [smem:[#allocation15_spill]]  ;;  %s2632_s13 = sadd.s32 4294967295, %s2525_s20   ;;  %s2525_s20 = sphi %s2623_s20, %s31_s20  }
   0x9   : > { %p2173_p0 = scmp.ge.s32.totalorder %s2525_s20, 1  ;;  %p402_p1 = scmp.lt.s32.totalorder %s2525_s20, 3 }
   0xa   : > { %p2275_p2 = scmp.eq.s32.totalorder %s2632_s13, 0  ;;  %s2527_s25 = smov [#allocation3]  }
   0xb   : > { %p2637_p3 = pnand %p2173_p0, %p402_p1  ;;  %s421_s26 = sshll.u32 %s2527_s25, 4  ;;  %s422_s26 = int_to_ptr.vmem [resolvable:$true] %s421_s26 }
   0xc   : > { %s3243_s7 = sld [smem:[#allocation16_spill]]  ;;  %s2528_s16 = smov [#allocation7]  }
   0xd   : > { %p2262_p4 = pneg %p2637_p3  ;;  %s435_s17 = sshll.u32 %s2528_s16, 4  ;;  %s436_s17 = int_to_ptr.vmem [resolvable:$true] %s435_s17 }
   0xe   : > { %s419_s23 = sshll.u32 %s3241_s6, 4  ;;  %s457_s21 = sshll.u32 %s3234_s11, 4  ;;  %s420_s23 = int_to_ptr.hbm [resolvable:$true] %s419_s23  ;;  %s458_s21 = int_to_ptr.hbm [resolvable:$true] %s457_s21 }
   0xf   : > { %p2648_p5 = pnand %p2275_p2, %p2262_p4  ;;  %s2529_s22 = smov 128  }
  0x10   : > { %s2530_s25 = smov 8   ;;  %s2531_s27 = smov [#allocation9]  }
  0x11   : > { %2265 = dma.hbm_to_vmem [thread:$0]  (!%p2648_p5), %s420_s23, 512, %s422_s26, [#allocation4], %s2529_s22, %s2529_s22, %s2530_s25  }
  0x12   : > { %s433_s29 = sshll.u32 %s3243_s7, 4  ;;  %s467_s7 = sshll.u32 %s3235_s12, 4  ;;  %s434_s29 = int_to_ptr.hbm [resolvable:$true] %s433_s29  ;;  %s468_s7 = int_to_ptr.vmem [resolvable:$true] %s467_s7 }
  0x13   : > { %2268 = dma.hbm_to_vmem [thread:$0]  (!%p2648_p5), %s434_s29, 512, %s436_s17, [#allocation8], %s2529_s22, %s2529_s22, %s2530_s25  }
  0x14   : > { %2271 = dma.hbm_to_smem (!%p2648_p5), %s458_s21, 32, %s2531_s27, [#allocation5]  }
  0x15   : > { %s2532_s16 = smov [#allocation10]   ;;  %513 = sbr.rel (%p2637_p3) target bundleno = 5771 (0x168b), region = 76 }
  0x16   : > { %2274 = dma.vmem_to_smem (!%p2648_p5), %s468_s7, 32, %s2532_s16, [#allocation6]  }
  0x1a   : > { %2508 = dma.done.wait (%p2275_p2), [#allocation4], 512  }
  0x1b   : > { %2510 = vsyncadd (%p2275_p2), [#allocation4], 4294966784 }
  0x1c   : > { %2512 = dma.done.wait (%p2275_p2), [#allocation8], 512  }
  0x1d   : > { %2514 = vsyncadd (%p2275_p2), [#allocation8], 4294966784 }
  0x1e   : > { %2516 = dma.done.wait (%p2275_p2), [#allocation5], 32  }
  0x1f   : > { %2518 = vsyncadd (%p2275_p2), [#allocation5], 4294967264 }
  0x20   : > { %2520 = dma.done.wait (%p2275_p2), [#allocation6], 32  }
  0x21   : > { %2522 = vsyncadd (%p2275_p2), [#allocation6], 4294967264 }
  0x22   : > { %535 = sfence }
  0x23   : > { %p593_p6 = scmp.lt.s32.totalorder %s2632_s13, 1  ;;  %vm667_vm0 = vcmask 130048   ;;  %v2533_v7 = vmov 0   ;;  %v650_v19 = vlaneseq  ;;  %v2534_v32 = vmov 0.0   ;;  %s641_s27 = sld [smem:[#allocation9]] }
  0x24   : > { %2304 = vset.pattern.permute.xlu1 %v2533_v7  ;;  %2306 = vset.pattern.permute.xlu0 %v2533_v7  ;;  %s2191_s28 = sld [smem:[#allocation9 + $0x1]]  ;;  %s2535_s26 = smov 32   ;;  %vm803_vm12 = vcmask 261120  }
  0x25   : > { %s3246_s13 = smov (!%p593_p6, %s2632_s13), 1  ;;  %2305 = vset.pattern.permute.xlu2 %v2533_v7  ;;  %v651_v24 = vshrl.u32 %v650_v19, 7  ;;  %v2741_v28 = vand.u32 127, %v650_v19  ;;  %s2192_s16 = sld [smem:[#allocation9 + $0x80]] }
  0x26   : > { %s2239_s6 = sshll.u32 %s3246_s13, 4  ;;  %s2693_s24 = scalar_lea.vmem %s3225_s2, %s3246_s13 }
  0x27   : > { %s2698_s30 = scalar_lea.vmem %s3223_s0, %s2239_s6  ;;  %v2701_v0 = vld [vmem:[%s2693_s24] ss:$0 sm:$0xff]  ;;  %s610_s19 = scalar_lea.vmem %s3226_s3, %s2239_s6  ;;  %v652_v27 = vadd.s32 8, %v651_v24  ;;  %vm655_vm2 = vcmp.eq.s32.totalorder %v651_v24, %v2741_v28  ;;  %vm661_vm7 = vcmp.lt.s32.totalorder %v2741_v28, 96 }
  0x28   : > { %v2704_v1 = vld [vmem:[%s2698_s30] sm:$0xff]  ;;  %v2709_v3 = vld [vmem:[%s2698_s30 + $0x8] sm:$0xff]  ;;  %s2727_s25 = scalar_lea.vmem %s3224_s1, %s2239_s6  ;;  %v2749_v34 = vsel %vm655_vm2, 1.0, %v2534_v32  ;;  %s2193_s6 = sld [smem:[#allocation9 + $0x81]] }
  0x29   : > { %v665_v2 = vmul.f32 %v2701_v0, %v2704_v1  ;;  %v666_v5 = vmul.f32 %v2701_v0, %v2709_v3  ;;  %v2718_v8 = vld [vmem:[%s610_s19 + $0x8] sm:$0xff]  ;;  %v2720_v9 = vld [vmem:[%s610_s19] sm:$0xff]  ;;  %vm656_vm1 = vcmp.eq.s32.totalorder %v652_v27, %v2741_v28  ;;  %v2763_v46 = vstv %s641_s27  ;;  %s645_s22 = sld [smem:[#allocation10]]  ;;  %s2536_s29 = smov 96  }
  0x2a   : > { %707 = vperm.xlu2 %2305, %v2720_v9   ;;  %v2730_v10 = vld [vmem:[%s2727_s25] sm:$0xff]  ;;  %v2734_v13 = vld [vmem:[%s2727_s25 + $0x8] sm:$0xff]  ;;  %v2746_v33 = vsel %vm656_vm1, 1.0, %v2534_v32  ;;  %v2765_v47 = vstv %s2191_s28  ;;  %s2195_s27 = sld [smem:[#allocation10 + $0x80]]  ;;  %s2537_s17 = smov 64  }
  0x2b   : > { %v668_v4 = vsel %vm667_vm0, %v665_v2, 0.0  ;;  %v671_v6 = vsel %vm667_vm0, %v666_v5, 0.0  ;;  %v2771_v52 = vstv %s2192_s16  ;;  %v2810_v27 = vld [vmem:[%s3228_s5] sm:$0xff]  ;;  %s2194_s28 = sld [smem:[#allocation10 + $0x1]]  ;;  %s617_s19 = scalar_lea.vmem %s3238_s15, %s3246_s13 }
  0x2c   : > { %669 = vadd.xlane.f32.xlu0 %v668_v4  ;;  %s2196_s16 = sld [smem:[#allocation10 + $0x81]] }
  0x2e   : > { %v2777_v59 = vstv %s2193_s6  ;;  %s2190_s6 = sshll.u32 %s3246_s13, 2 }
  0x34   : > { %672 = vadd.xlane.f32.xlu0 %v671_v6 }
  0x48   : > { %712 = vperm.xlu0 %2306, %v2718_v8  }
  0x84   : > { %v708_v40 = vpop.permute.xlu2 %707 }
  0x85   : > { %v715_v42 = vmul.f32 %v2701_v0, %v708_v40 }
  0x87   : > { %v718_v48 = vmul.f32 %v2763_v46, %v715_v42 }
  0x9f   : > { %v670_v11 = vpop.xlane.xlu0 %669 }
  0xa0   : > { %v674_v12 = vsub.f32 %v670_v11, %v2730_v10 }
  0xa2   : > { %678 = vperm.xlu1 %2304, %v674_v12  }
  0xa7   : > { %v673_v14 = vpop.xlane.xlu0 %672 }
  0xa8   : > { %v675_v15 = vsub.f32 %v673_v14, %v2734_v13  ;;  %v2788_v14 = vld [vmem:[%s3228_s5 + $0x18] sm:$0xff] }
  0xa9   : > { %819 = vmatpush.msra.mxu0 %v2788_v14  ;;  %2242 = vmatpush.msra.mxu1 %v2788_v14 }
  0xaa   : > { %683 = vperm.xlu1 %2304, %v675_v15   ;;  %1246 = vmatpush.msra.mxu3 %v2788_v14 }
  0xba   : > { %v713_v41 = vpop.permute.xlu0 %712 }
  0xbb   : > { %v716_v44 = vmul.f32 %v2701_v0, %v713_v41 }
  0xbd   : > { %v719_v50 = vmul.f32 %v2763_v46, %v716_v44 }
 0x114   : > { %v679_v16 = vpop.permute.xlu1 %678 }
 0x115   : > { %v686_v17 = vmul.f32 %v679_v16, %v2704_v1 }
 0x117   : > { %v688_v21 = vsel %vm667_vm0, %v686_v17, 0.0 }
 0x11c   : > { %v684_v18 = vpop.permute.xlu1 %683 }
 0x11d   : > { %v687_v20 = vmul.f32 %v684_v18, %v2709_v3 }
 0x11f   : > { %v689_v22 = vsel %vm667_vm0, %v687_v20, 0.0 }
 0x120   : > { %v690_v23 = vadd.f32 %v689_v22, %v688_v21 }
 0x122   : > { %v691_v25 = vrot.slane %v690_v23, 4 }
 0x124   : > { %v692_v26 = vadd.f32 %v691_v25, %v690_v23  ;;  %v2798_v25 = vld [vmem:[%s3228_s5 + $0x10] sm:$0xff] }
 0x125   : > { %820 = vmatpush.msra.mxu0 %v2798_v25  ;;  %2243 = vmatpush.msra.mxu1 %v2798_v25 }
 0x126   : > { %v693_v29 = vrot.slane %v692_v26, 2  ;;  %1247 = vmatpush.msra.mxu3 %v2798_v25 }
 0x128   : > { %v694_v30 = vadd.f32 %v693_v29, %v692_v26  ;;  %v2803_v26 = vld [vmem:[%s3228_s5 + $0x8] sm:$0xff]  ;;  %v2822_v29 = vld [vmem:[%s2693_s24] sm:$0x1]  ;;  %s2538_s24 = smov 1  }
 0x129   : > { %821 = vmatpush.msra.mxu0 %v2803_v26  ;;  %2244 = vmatpush.msra.mxu1 %v2803_v26 }
 0x12a   : > { %v695_v31 = vrot.slane %v694_v30, 1  ;;  %1248 = vmatpush.msra.mxu3 %v2803_v26 }
 0x12b   : > { %822 = vmatpush.msra.mxu0 %v2810_v27  ;;  %2245 = vmatpush.msra.mxu1 %v2810_v27 }
 0x12c   : > { %v2751_v35 = vadd.f32 %v695_v31, %v694_v30  ;;  %823 = vmatmul.f32.vlgmr.msra.gmra.mxu0 %v2534_v32  ;;  %826 = vmatmul.f32.vlgmr.msra.gmra.mxu1 %v2534_v32  ;;  %v2824_v30 = vstv %s645_s22  ;;  %v2826_v31 = vstv %s2195_s27  ;;  %s649_s27 = sld [smem:[#allocation2]] }
 0x12d   : > { %1249 = vmatpush.msra.mxu3 %v2810_v27 }
 0x12e   : > { %v698_v36 = vmul.f32 %v2746_v33, %v2751_v35  ;;  %v697_v37 = vmul.f32 %v2749_v34, %v2751_v35  ;;  %v720_v43 = vmul.f32 %v708_v40, %v2751_v35  ;;  %v721_v45 = vmul.f32 %v713_v41, %v2751_v35 }
 0x12f   : > { %v766_v40 = vmul.f32 %v2826_v31, %v2751_v35 }
 0x130   : > { %v702_v38 = vsel %vm667_vm0, %v698_v36, 0.0  ;;  %v699_v39 = vsel %vm667_vm0, %v697_v37, 0.0  ;;  %v723_v49 = vmul.f32 %v2765_v47, %v720_v43  ;;  %v724_v51 = vmul.f32 %v2765_v47, %v721_v45 }
 0x131   : > { %703 = vadd.xlane.f32.xlu1 %v702_v38  ;;  %700 = vadd.xlane.f32.xlu2 %v699_v39  ;;  %v2828_v36 = vstv %s2194_s28  ;;  %v2830_v37 = vstv %s2196_s16  ;;  %v764_v39 = vmul.f32 %v2824_v30, %v2822_v29 }
 0x132   : > { %v725_v60 = vadd.f32 %v723_v49, %v718_v48  ;;  %v726_v61 = vadd.f32 %v724_v51, %v719_v50  ;;  %v769_v41 = vmul.f32 %v2828_v36, %v2822_v29  ;;  %v771_v42 = vmul.f32 %v2830_v37, %v2751_v35 }
 0x133   : > { %v767_v44 = vadd.f32 %v766_v40, %v764_v39 }
 0x134   : > { %v772_v45 = vadd.f32 %v771_v42, %v769_v41 }
 0x135   : > { %v774_v50 = vperm.slane %v767_v44, 0 }
 0x136   : > { %v785_v51 = vperm.slane %v772_v45, 0 }
 0x1a4   : > { %v704_v53 = vpop.xlane.xlu1 %703  ;;  %v701_v54 = vpop.xlane.xlu2 %700 }
 0x1a5   : > { %v728_v55 = vmul.f32 %v2701_v0, %v704_v53  ;;  %v735_v56 = vmul.f32 %v704_v53, %v2751_v35  ;;  %v727_v57 = vmul.f32 %v2701_v0, %v701_v54  ;;  %v734_v58 = vmul.f32 %v701_v54, %v2751_v35 }
 0x1a7   : > { %v731_v62 = vmul.f32 %v2771_v52, %v728_v55  ;;  %v730_v63 = vmul.f32 %v2771_v52, %v727_v57  ;;  %v738_v2 = vmul.f32 %v2777_v59, %v735_v56  ;;  %v737_v4 = vmul.f32 %v2777_v59, %v734_v58 }
 0x1a9   : > { %v732_v5 = vadd.f32 %v730_v63, %v725_v60  ;;  %v733_v6 = vadd.f32 %v731_v62, %v726_v61  ;;  %v625_v63 = vld [vmem:[%s3227_s4] sm:$0x3] }
 0x1ab   : > { %v739_v7 = vadd.f32 %v737_v4, %v732_v5  ;;  %v740_v11 = vadd.f32 %v738_v2, %v733_v6  ;;  %v2847_v2 = vperm.slane %v625_v63, 0  ;;  %v2849_v4 = vperm.slane %v625_v63, 1 }
 0x1ad   : > { %v741_v0 = vsel %vm667_vm0, %v739_v7, -inf  ;;  %v744_v12 = vsel %vm667_vm0, %v740_v11, -inf }
 0x1ae   : > { %742 = vmax.xlane.f32.xlu2 %v741_v0  ;;  %745 = vmax.xlane.f32.xlu0 %v744_v12  ;;  %v824_v0 = vpop.f32.mrf.mxu0 }
 0x221   : > { %v743_v15 = vpop.xlane.xlu2 %742  ;;  %v746_v16 = vpop.xlane.xlu0 %745 }
 0x222   : > { %v747_v17 = vsub.f32 %v739_v7, %v743_v15  ;;  %v748_v18 = vsub.f32 %v740_v11, %v746_v16  ;;  %v2856_v15 = vld [vmem:[%s3231_s8] ss:$0 sm:$0xff] }
 0x224   : > { %v749_v19 = vmul.f32 1.442695, %v747_v17  ;;  %v751_v20 = vmul.f32 1.442695, %v748_v18 }
 0x226   : > { %2311 = vpow2.f32 %v749_v19 }
 0x227   : > { %2313 = vpow2.f32 %v751_v20 }
 0x22c   : > { %v2312_v21 = vpop.eup %2311 }
 0x22d   : > { %v2314_v22 = vpop.eup %2313  ;;  %v753_v23 = vsel %vm667_vm0, %v2312_v21, 0.0 }
 0x22e   : > { %754 = vadd.xlane.f32.xlu2 %v753_v23  ;;  %v756_v24 = vsel %vm667_vm0, %v2314_v22, 0.0  ;;  %v827_v23 = vpop.f32.mrf.mxu1 }
 0x22f   : > { %757 = vadd.xlane.f32.xlu1 %v756_v24 }
 0x2a1   : > { %v755_v38 = vpop.xlane.xlu2 %754 }
 0x2a2   : > { %2315 = vrcp.f32 %v755_v38  ;;  %v758_v43 = vpop.xlane.xlu1 %757 }
 0x2a3   : > { %2317 = vrcp.f32 %v758_v43 }
 0x2a8   : > { %v2316_v48 = vpop.eup %2315 }
 0x2a9   : > { %v761_v49 = vmul.f32 %v2316_v48, %v2312_v21  ;;  %v2318_v53 = vpop.eup %2317 }
 0x2aa   : > { %v762_v58 = vmul.f32 %v2318_v53, %v2314_v22 }
 0x2ab   : > { %v776_v54 = vmul.f32 %v774_v50, %v761_v49  ;;  %v787_v55 = vmul.f32 %v785_v51, %v761_v49 }
 0x2ac   : > { %v788_v35 = vmul.f32 %v785_v51, %v762_v58  ;;  %v777_v60 = vmul.f32 %v774_v50, %v762_v58 }
 0x2ad   : > { %v778_v56 = vsel %vm667_vm0, %v776_v54, 0.0  ;;  %v789_v57 = vsel %vm667_vm0, %v787_v55, 0.0 }
 0x2ae   : > { %779 = vadd.xlane.f32.xlu2 %v778_v56  ;;  %790 = vadd.xlane.f32.xlu1 %v789_v57  ;;  %v792_v61 = vsel %vm667_vm0, %v788_v35, 0.0  ;;  %v781_v62 = vsel %vm667_vm0, %v777_v60, 0.0 }
 0x2b6   : > { %793 = vadd.xlane.f32.xlu1 %v792_v61  ;;  %782 = vadd.xlane.f32.xlu2 %v781_v62 }
 0x321   : > { %v780_v5 = vpop.xlane.xlu2 %779  ;;  %v791_v6 = vpop.xlane.xlu1 %790 }
 0x322   : > { %v796_v7 = vmul.f32 %v2847_v2, %v780_v5  ;;  %v799_v11 = vmul.f32 %v2849_v4, %v791_v6 }
 0x324   : > { %v801_v12 = vadd.f32 %v799_v11, %v796_v7 }
 0x326   : > { %v830_v16 = vadd.f32 %v824_v0, %v801_v12 }
 0x328   : > { %v835_v17 = vadd.f32 %v2856_v15, %v830_v16 }
 0x329   : > { %v783_v18 = vpop.xlane.xlu2 %782  ;;  %v794_v19 = vpop.xlane.xlu1 %793 }
 0x32a   : > { %v2199_v20 = vmul.f32 -1.442695, %v835_v17  ;;  %v797_v21 = vmul.f32 %v2847_v2, %v783_v18  ;;  %v800_v22 = vmul.f32 %v2849_v4, %v794_v19 }
 0x32c   : > { %2319 = vpow2.f32 %v2199_v20  ;;  %v802_v24 = vadd.f32 %v800_v22, %v797_v21 }
 0x32e   : > { %v831_v38 = vadd.f32 %v827_v23, %v802_v24 }
 0x330   : > { %v836_v39 = vadd.f32 %v2856_v15, %v831_v38 }
 0x332   : > { %v2320_v40 = vpop.eup %2319  ;;  %v2200_v41 = vmul.f32 -1.442695, %v836_v39 }
 0x333   : > { %v843_v42 = vadd.f32 1.0, %v2320_v40 }
 0x334   : > { %2321 = vpow2.f32 %v2200_v41 }
 0x335   : > { %2323 = vrcp.f32 %v843_v42  ;;  %v856_v50 = vand.u32 2147483648, %v843_v42  ;;  %v854_v53 = vand.u32 2147483647, %v843_v42  ;;  %vm850_vm4 = vweird.f32 %v843_v42 }
 0x337   : > { %v857_v56 = vor.u32 1.1754944e-38, %v856_v50  ;;  %vm855_vm6 = vcmp.eq.f32.partialorder %v854_v53, 8.507059e+37  ;;  %v632_v53 = vld [vmem:[#allocation3 + $0x10] sm:$0xff] }
 0x33a   : > { %v2322_v43 = vpop.eup %2321 }
 0x33b   : > { %v2324_v44 = vpop.eup %2323  ;;  %v844_v45 = vadd.f32 1.0, %v2322_v43 }
 0x33c   : > { %v846_v48 = vmul.f32 %v2324_v44, %v843_v42  ;;  %vm851_vm3 = vweird.f32 %v2324_v44 }
 0x33d   : > { %2325 = vrcp.f32 %v844_v45  ;;  %vm852_vm5 = vmor %vm850_vm4, %vm851_vm3  ;;  %v871_v62 = vand.u32 2147483648, %v844_v45  ;;  %v869_v6 = vand.u32 2147483647, %v844_v45  ;;  %vm865_vm9 = vweird.f32 %v844_v45 }
 0x33e   : > { %v847_v49 = vsub.f32 1.0, %v846_v48 }
 0x33f   : > { %v872_v12 = vor.u32 1.1754944e-38, %v871_v62  ;;  %vm870_vm11 = vcmp.eq.f32.partialorder %v869_v6, 8.507059e+37 }
 0x340   : > { %v848_v51 = vmul.f32 %v2324_v44, %v847_v49 }
 0x342   : > { %v849_v54 = vadd.f32 %v2324_v44, %v848_v51  ;;  %v633_v51 = vld [vmem:[#allocation3 + $0x18] sm:$0xff] }
 0x343   : > { %v2326_v55 = vpop.eup %2325  ;;  %960 = vmatpush.msra.mxu2 %v633_v51 }
 0x344   : > { %v853_v57 = vsel %vm852_vm5, %v2324_v44, %v849_v54  ;;  %v861_v58 = vmul.f32 %v2326_v55, %v844_v45  ;;  %vm866_vm8 = vweird.f32 %v2326_v55  ;;  %v637_v54 = vld [vmem:[#allocation7 + $0x18] sm:$0xff] }
 0x345   : > { %v858_v35 = vsel %vm855_vm6, %v857_v56, %v853_v57  ;;  %vm867_vm10 = vmor %vm865_vm9, %vm866_vm8  ;;  %927 = vmatpush.msrb.mxu1 %v637_v54  ;;  %1369 = vmatpush.msrb.mxu0 %v637_v54  ;;  %v630_v56 = vld [vmem:[#allocation3] sm:$0xff]  ;;  %v636_v57 = vld [vmem:[#allocation7 + $0x10] sm:$0xff]  ;;  %vm1107_vm6 = vcmask 7168  }
 0x346   : > { %v875_v60 = vmul.f32 2.0, %v858_v35  ;;  %v862_v61 = vsub.f32 1.0, %v861_v58  ;;  %961 = vmatpush.msra.mxu2 %v632_v53  ;;  %1809 = vmatpush.msrb.mxu3 %v637_v54  ;;  %v635_v58 = vld [vmem:[#allocation7 + $0x8] sm:$0xff] }
 0x347   : > { %928 = vmatpush.msrb.mxu1 %v636_v57  ;;  %1370 = vmatpush.msrb.mxu0 %v636_v57 }
 0x348   : > { %v2201_v63 = vadd.f32 -1.0, %v875_v60  ;;  %v863_v5 = vmul.f32 %v2326_v55, %v862_v61  ;;  %1810 = vmatpush.msrb.mxu3 %v636_v57 }
 0x349   : > { %929 = vmatpush.msrb.mxu1 %v635_v58  ;;  %1371 = vmatpush.msrb.mxu0 %v635_v58 }
 0x34a   : > { %v879_v7 = vsel %vm661_vm7, %v858_v35, %v2201_v63  ;;  %v864_v11 = vadd.f32 %v2326_v55, %v863_v5  ;;  %v634_v35 = vld [vmem:[#allocation7] sm:$0xff]  ;;  %1811 = vmatpush.msrb.mxu3 %v635_v58 }
 0x34b   : > { %883 = vrot.lane.b32.xlu2 %v879_v7, %s2535_s26  ;;  %v891_v0 = vmul.f32 0.0, %v879_v7  ;;  %930 = vmatpush.msrb.mxu1 %v634_v35 }
 0x34c   : > { %v868_v16 = vsel %vm867_vm10, %v2326_v55, %v864_v11  ;;  %v631_v55 = vld [vmem:[#allocation3 + $0x8] sm:$0xff]  ;;  %1372 = vmatpush.msrb.mxu0 %v634_v35  ;;  %931 = vmatmul.f32.vlgmr.msrb.gmra.mxu1 %v2534_v32 }
 0x34d   : > { %895 = vrot.lane.b32.xlu1 %v891_v0, %s2536_s29  ;;  %v873_v17 = vsel %vm870_vm11, %v872_v12, %v868_v16  ;;  %962 = vmatpush.msra.mxu2 %v631_v55 }
 0x34e   : > { %v876_v18 = vmul.f32 2.0, %v873_v17  ;;  %1812 = vmatpush.msrb.mxu3 %v634_v35  ;;  %1402 = vmatpush.msra.mxu1 %v633_v51 }
 0x34f   : > { %963 = vmatpush.msra.mxu2 %v630_v56  ;;  %1842 = vmatpush.msra.mxu0 %v633_v51 }
 0x350   : > { %v2202_v19 = vadd.f32 -1.0, %v876_v18  ;;  %1403 = vmatpush.msra.mxu1 %v632_v53 }
 0x351   : > { %1686 = vmatpush.msrb.mxu2 %v2788_v14  ;;  %1843 = vmatpush.msra.mxu0 %v632_v53 }
 0x352   : > { %v880_v20 = vsel %vm661_vm7, %v873_v17, %v2202_v19  ;;  %1404 = vmatpush.msra.mxu1 %v631_v55 }
 0x353   : > { %885 = vrot.lane.b32.xlu0 %v880_v20, %s2535_s26  ;;  %v892_v21 = vmul.f32 0.0, %v880_v20  ;;  %1687 = vmatpush.msrb.mxu2 %v2798_v25 }
 0x354   : > { %1844 = vmatpush.msra.mxu0 %v631_v55  ;;  %1405 = vmatpush.msra.mxu1 %v630_v56 }
 0x355   : > { %897 = vrot.lane.b32.xlu2 %v892_v21, %s2536_s29  ;;  %1688 = vmatpush.msrb.mxu2 %v2803_v26 }
 0x356   : > { %1845 = vmatpush.msra.mxu0 %v630_v56  ;;  %934 = vmatmul.f32.gmra.mxu1 %v2534_v32 }
 0x357   : > { %1689 = vmatpush.msrb.mxu2 %v2810_v27  ;;  %v2894_v27 = vld [vmem:[%s3232_s9] ss:$0 sm:$0xff] }
 0x3a5   : > { %v884_v22 = vpop.permute.xlu2 %883 }
 0x3a6   : > { %v889_v23 = vmul.f32 %v884_v22, %v879_v7 }
 0x3af   : > { %v898_v41 = vpop.permute.xlu2 %897 }
 0x3bf   : > { %v896_v24 = vpop.permute.xlu1 %895 }
 0x3c0   : > { %v2871_v38 = vadd.f32 %v896_v24, %v889_v23 }
 0x3c2   : > { %2327 = vtanh.f32 %v2871_v38 }
 0x3c5   : > { %v886_v39 = vpop.permute.xlu0 %885 }
 0x3c6   : > { %v890_v40 = vmul.f32 %v886_v39, %v880_v20 }
 0x3c8   : > { %v2328_v42 = vpop.eup %2327  ;;  %v2874_v43 = vadd.f32 %v898_v41, %v890_v40 }
 0x3c9   : > { %907 = vrot.lane.b32.xlu1 %v2328_v42, %s2537_s17  ;;  %v932_v26 = vpop.f32.mrf.mxu1 }
 0x3ca   : > { %2329 = vtanh.f32 %v2874_v43 }
 0x3d0   : > { %v2330_v44 = vpop.eup %2329 }
 0x3d1   : > { %909 = vrot.lane.b32.xlu2 %v2330_v44, %s2537_s17 }
 0x3d3   : > { %v935_v63 = vpop.f32.mrf.mxu1 }
 0x42b   : > { %v910_v45 = vpop.permute.xlu2 %909 }
 0x42c   : > { %v914_v48 = vmul.f32 %v910_v45, %v880_v20 }
 0x42e   : > { %942 = vrot.lane.b32.xlu0 %v914_v48, %s2537_s17 }
 0x43b   : > { %v908_v49 = vpop.permute.xlu1 %907 }
 0x43c   : > { %v913_v50 = vmul.f32 %v908_v49, %v879_v7 }
 0x43e   : > { %940 = vrot.lane.b32.xlu1 %v913_v50, %s2537_s17 }
 0x4a0   : > { %v943_v25 = vpop.permute.xlu0 %942 }
 0x4b0   : > { %v941_v14 = vpop.permute.xlu1 %940 }
 0x4b1   : > { %2203 = vmatmul.msk.f32.vlgmr.msra.gmra.mxu2 %vm803_vm12, %v941_v14  ;;  %2209 = vmatmul.msk.f32.vlgmr.msra.gmra.mxu3 %vm803_vm12, %v941_v14 }
 0x4b9   : > { %2204 = vmatmul.msk.f32.gmra.mxu2 %vm803_vm12, %v943_v25  ;;  %2210 = vmatmul.msk.f32.gmra.mxu3 %vm803_vm12, %v943_v25 }
 0x534   : > { %v965_v60 = vpop.f32.mrf.mxu2 }
 0x535   : > { %v966_v61 = vadd.f32 %v965_v60, %v932_v26 }
 0x537   : > { %v974_v32 = vadd.f32 %v2894_v27, %v966_v61  ;;  %v2310_v61 = vld [vmem:[%s3233_s10] ss:$0 sm:$0xff] }
 0x539   : > { %v2205_v62 = vmul.f32 -1.442695, %v974_v32 }
 0x53b   : > { %2331 = vpow2.f32 %v2205_v62 }
 0x53c   : > { %v968_v5 = vpop.f32.mrf.mxu2 }
 0x53d   : > { %v969_v6 = vadd.f32 %v968_v5, %v935_v63 }
 0x53f   : > { %v975_v7 = vadd.f32 %v2894_v27, %v969_v6 }
 0x541   : > { %v2332_v11 = vpop.eup %2331  ;;  %v2206_v0 = vmul.f32 -1.442695, %v975_v7 }
 0x542   : > { %v982_v12 = vadd.f32 1.0, %v2332_v11 }
 0x543   : > { %2333 = vpow2.f32 %v2206_v0 }
 0x544   : > { %2335 = vrcp.f32 %v982_v12  ;;  %v995_v21 = vand.u32 2147483648, %v982_v12  ;;  %v993_v23 = vand.u32 2147483647, %v982_v12  ;;  %vm989_vm14 = vweird.f32 %v982_v12 }
 0x546   : > { %v996_v40 = vor.u32 1.1754944e-38, %v995_v21  ;;  %vm994_vm1 = vcmp.eq.f32.partialorder %v993_v23, 8.507059e+37 }
 0x549   : > { %v2334_v16 = vpop.eup %2333 }
 0x54a   : > { %v2336_v17 = vpop.eup %2335  ;;  %v983_v18 = vadd.f32 1.0, %v2334_v16 }
 0x54b   : > { %v985_v19 = vmul.f32 %v2336_v17, %v982_v12  ;;  %vm990_vm13 = vweird.f32 %v2336_v17 }
 0x54c   : > { %2337 = vrcp.f32 %v983_v18  ;;  %vm991_vm15 = vmor %vm989_vm14, %vm990_vm13  ;;  %v1010_v49 = vand.u32 2147483648, %v983_v18  ;;  %v1008_v53 = vand.u32 2147483647, %v983_v18  ;;  %vm1004_vm3 = vweird.f32 %v983_v18 }
 0x54d   : > { %v986_v20 = vsub.f32 1.0, %v985_v19 }
 0x54e   : > { %v1011_v57 = vor.u32 1.1754944e-38, %v1010_v49  ;;  %vm1009_vm5 = vcmp.eq.f32.partialorder %v1008_v53, 8.507059e+37 }
 0x54f   : > { %v987_v22 = vmul.f32 %v2336_v17, %v986_v20 }
 0x551   : > { %v988_v24 = vadd.f32 %v2336_v17, %v987_v22 }
 0x552   : > { %v2338_v39 = vpop.eup %2337 }
 0x553   : > { %v992_v41 = vsel %vm991_vm15, %v2336_v17, %v988_v24  ;;  %v1000_v42 = vmul.f32 %v2338_v39, %v983_v18  ;;  %vm1005_vm2 = vweird.f32 %v2338_v39 }
 0x554   : > { %v997_v44 = vsel %vm994_vm1, %v996_v40, %v992_v41  ;;  %vm1006_vm4 = vmor %vm1004_vm3, %vm1005_vm2 }
 0x555   : > { %v1014_v45 = vmul.f32 2.0, %v997_v44  ;;  %v1001_v48 = vsub.f32 1.0, %v1000_v42  ;;  %v2932_v42 = vstv %s649_s27 }
 0x557   : > { %v2207_v50 = vadd.f32 -1.0, %v1014_v45  ;;  %v1002_v51 = vmul.f32 %v2338_v39, %v1001_v48 }
 0x559   : > { %v1018_v54 = vsel %vm661_vm7, %v997_v44, %v2207_v50  ;;  %v1003_v55 = vadd.f32 %v2338_v39, %v1002_v51 }
 0x55a   : > { %1022 = vrot.lane.b32.xlu2 %v1018_v54, %s2535_s26  ;;  %v1030_v56 = vmul.f32 0.0, %v1018_v54 }
 0x55b   : > { %v1007_v58 = vsel %vm1006_vm4, %v2338_v39, %v1003_v55 }
 0x55c   : > { %1034 = vrot.lane.b32.xlu0 %v1030_v56, %s2536_s29  ;;  %v1012_v35 = vsel %vm1009_vm5, %v1011_v57, %v1007_v58 }
 0x55d   : > { %v1015_v14 = vmul.f32 2.0, %v1012_v35 }
 0x55f   : > { %v2208_v25 = vadd.f32 -1.0, %v1015_v14 }
 0x561   : > { %v1019_v26 = vsel %vm661_vm7, %v1012_v35, %v2208_v25 }
 0x562   : > { %1024 = vrot.lane.b32.xlu1 %v1019_v26, %s2535_s26  ;;  %v1031_v60 = vmul.f32 0.0, %v1019_v26 }
 0x564   : > { %1036 = vrot.lane.b32.xlu2 %v1031_v60, %s2536_s29 }
 0x56c   : > { %1056 = vrot.lane.b32.xlu2 %v2310_v61, %s2537_s17 }
 0x5b4   : > { %v1023_v32 = vpop.permute.xlu2 %1022 }
 0x5b5   : > { %v1028_v62 = vmul.f32 %v1023_v32, %v1018_v54 }
 0x5be   : > { %v1037_v11 = vpop.permute.xlu2 %1036 }
 0x5c6   : > { %v2918_v18 = vpop.permute.xlu2 %1056 }
 0x5ce   : > { %v1035_v63 = vpop.permute.xlu0 %1034 }
 0x5cf   : > { %v2910_v5 = vadd.f32 %v1035_v63, %v1028_v62 }
 0x5d1   : > { %2339 = vtanh.f32 %v2910_v5 }
 0x5d4   : > { %v1025_v6 = vpop.permute.xlu1 %1024 }
 0x5d5   : > { %v1029_v7 = vmul.f32 %v1025_v6, %v1019_v26 }
 0x5d7   : > { %v2340_v0 = vpop.eup %2339  ;;  %v2913_v12 = vadd.f32 %v1037_v11, %v1029_v7 }
 0x5d8   : > { %1046 = vrot.lane.b32.xlu1 %v2340_v0, %s2537_s17 }
 0x5d9   : > { %2341 = vtanh.f32 %v2913_v12 }
 0x5df   : > { %v2342_v16 = vpop.eup %2341 }
 0x5e0   : > { %1048 = vrot.lane.b32.xlu0 %v2342_v16, %s2537_s17 }
 0x64a   : > { %v1047_v17 = vpop.permute.xlu1 %1046 }
 0x64b   : > { %v2920_v19 = vmul.f32 %v1047_v17, %v1018_v54 }
 0x64d   : > { %v1059_v20 = vmul.f32 %v2918_v18, %v2920_v19 }
 0x64f   : > { %1063 = vrot.lane.b32.xlu1 %v1059_v20, %s2537_s17 }
 0x652   : > { %v1049_v21 = vpop.permute.xlu0 %1048 }
 0x653   : > { %v2925_v22 = vmul.f32 %v1049_v21, %v1019_v26 }
 0x655   : > { %v1060_v23 = vmul.f32 %v2918_v18, %v2925_v22 }
 0x657   : > { %1065 = vrot.lane.b32.xlu0 %v1060_v23, %s2537_s17 }
 0x6c1   : > { %v1064_v24 = vpop.permute.xlu1 %1063 }
 0x6c2   : > { %v1069_v39 = vsel %vm803_vm12, %v1064_v24, 0.0 }
 0x6c3   : > { %1070 = vadd.xlane.f32.xlu2 %v1069_v39 }
 0x6c9   : > { %v1066_v40 = vpop.permute.xlu0 %1065 }
 0x6ca   : > { %v1072_v41 = vsel %vm803_vm12, %v1066_v40, 0.0 }
 0x6cb   : > { %1073 = vadd.xlane.f32.xlu1 %v1072_v41 }
 0x736   : > { %v1071_v44 = vpop.xlane.xlu2 %1070 }
 0x737   : > { %v1076_v45 = vadd.f32 %v2932_v42, %v1071_v44 }
 0x739   : > { %v1078_v49 = vmul.f32 %v2749_v34, %v1076_v45  ;;  %v2949_v6 = vsub.f32 %v2720_v9, %v1076_v45 }
 0x73b   : > { %v1080_v53 = vsel %vm667_vm0, %v1078_v49, 0.0 }
 0x73e   : > { %v1074_v48 = vpop.xlane.xlu1 %1073 }
 0x73f   : > { %v1077_v50 = vadd.f32 %v2932_v42, %v1074_v48 }
 0x741   : > { %v1079_v51 = vmul.f32 %v2746_v33, %v1077_v50  ;;  %v2959_v9 = vsub.f32 %v2718_v8, %v1077_v50 }
 0x743   : > { %v1081_v54 = vsel %vm667_vm0, %v1079_v51, 0.0 }
 0x744   : > { %v1082_v55 = vadd.f32 %v1081_v54, %v1080_v53 }
 0x746   : > { %v1083_v56 = vrot.slane %v1082_v55, 4 }
 0x748   : > { %v1084_v57 = vadd.f32 %v1083_v56, %v1082_v55 }
 0x74a   : > { %v1085_v58 = vrot.slane %v1084_v57, 2 }
 0x74c   : > { %v1086_v35 = vadd.f32 %v1085_v58, %v1084_v57 }
 0x74e   : > { %v1087_v14 = vrot.slane %v1086_v35, 1 }
 0x750   : > { %v1088_v25 = vadd.f32 %v1087_v14, %v1086_v35 }
 0x752   : > { %v2941_v26 = vsub.f32 %v2822_v29, %v1088_v25 }
 0x754   : > { %v1093_v60 = vperm.slane %v2941_v26, 0 }
 0x756   : > { %v1096_v61 = vmul.f32 %v1093_v60, %v2709_v3  ;;  %v1095_v32 = vmul.f32 %v1093_v60, %v2704_v1 }
 0x758   : > { %v1100_v62 = vsel %vm667_vm0, %v1096_v61, 0.0  ;;  %v1097_v63 = vsel %vm667_vm0, %v1095_v32, 0.0 }
 0x759   : > { %1101 = vadd.xlane.f32.xlu2 %v1100_v62  ;;  %1098 = vadd.xlane.f32.xlu0 %v1097_v63 }
 0x771   : > { %1148 = vperm.xlu2 %2305, %v2949_v6  }
 0x7cc   : > { %v1102_v7 = vpop.xlane.xlu2 %1101  ;;  %v1099_v29 = vpop.xlane.xlu0 %1098 }
 0x7cd   : > { %v1104_v11 = vsub.f32 %v1102_v7, %v2734_v13  ;;  %v1103_v0 = vsub.f32 %v1099_v29, %v2730_v10 }
 0x7cf   : > { %v1106_v16 = vmul.f32 %v1104_v11, %v1104_v11  ;;  %v1105_v17 = vmul.f32 %v1103_v0, %v1103_v0  ;;  %1124 = vperm.xlu0 %2306, %v1104_v11   ;;  %1119 = vperm.xlu1 %2304, %v1103_v0  }
 0x7d1   : > { %v1109_v20 = vsel %vm1107_vm6, %v1106_v16, 0.0  ;;  %v1108_v21 = vsel %vm1107_vm6, %v1105_v17, 0.0 }
 0x7d2   : > { %v2956_v23 = vadd.f32 %v1109_v20, %v1108_v21 }
 0x7d7   : > { %1153 = vperm.xlu1 %2304, %v2959_v9  }
 0x841   : > { %v1120_v24 = vpop.permute.xlu1 %1119  ;;  %v1125_v13 = vpop.permute.xlu0 %1124 }
 0x842   : > { %v1127_v10 = vmul.f32 %v1120_v24, %v2704_v1  ;;  %v1128_v39 = vmul.f32 %v1125_v13, %v2709_v3  ;;  %v1149_v3 = vpop.permute.xlu2 %1148 }
 0x843   : > { %v1156_v35 = vmul.f32 %v1149_v3, %v1093_v60 }
 0x844   : > { %v1129_v40 = vsel %vm667_vm0, %v1127_v10, 0.0  ;;  %v1130_v41 = vsel %vm667_vm0, %v1128_v39, 0.0 }
 0x845   : > { %v1131_v44 = vadd.f32 %v1130_v41, %v1129_v40  ;;  %v1158_v32 = vmul.f32 %v1156_v35, %v2763_v46 }
 0x847   : > { %v1132_v45 = vrot.slane %v1131_v44, 4 }
 0x849   : > { %v1133_v48 = vadd.f32 %v1132_v45, %v1131_v44  ;;  %v1154_v56 = vpop.permute.xlu1 %1153 }
 0x84a   : > { %v1157_v14 = vmul.f32 %v1154_v56, %v1093_v60 }
 0x84b   : > { %v1134_v49 = vrot.slane %v1133_v48, 2 }
 0x84c   : > { %v1159_v62 = vmul.f32 %v1157_v14, %v2763_v46 }
 0x84d   : > { %v1135_v51 = vadd.f32 %v1134_v49, %v1133_v48 }
 0x84f   : > { %v1136_v53 = vrot.slane %v1135_v51, 1 }
 0x851   : > { %v1137_v8 = vadd.f32 %v1136_v53, %v1135_v51 }
 0x853   : > { %v1139_v50 = vmul.f32 %v2746_v33, %v1137_v8  ;;  %v1138_v54 = vmul.f32 %v2749_v34, %v1137_v8  ;;  %v1161_v57 = vmul.f32 %v1154_v56, %v1137_v8  ;;  %v1160_v58 = vmul.f32 %v1149_v3, %v1137_v8 }
 0x854   : > { %v1201_v35 = vmul.f32 %v1137_v8, %v2826_v31 }
 0x855   : > { %v1143_v55 = vsel %vm667_vm0, %v1139_v50, 0.0  ;;  %v1140_v1 = vsel %vm667_vm0, %v1138_v54, 0.0  ;;  %v1163_v25 = vmul.f32 %v1161_v57, %v2765_v47  ;;  %v1162_v61 = vmul.f32 %v1160_v58, %v2765_v47 }
 0x856   : > { %1144 = vadd.xlane.f32.xlu2 %v1143_v55  ;;  %1141 = vadd.xlane.f32.xlu0 %v1140_v1  ;;  %v1204_v58 = vmul.f32 %v1137_v8, %v2830_v37 }
 0x857   : > { %v1165_v17 = vadd.f32 %v1163_v25, %v1159_v62  ;;  %v1164_v24 = vadd.f32 %v1162_v61, %v1158_v32  ;;  %v1203_v25 = vmul.f32 %v2941_v26, %v2828_v36  ;;  %v1200_v61 = vmul.f32 %v2941_v26, %v2824_v30 }
 0x859   : > { %v1205_v32 = vadd.f32 %v1204_v58, %v1203_v25  ;;  %v1202_v62 = vadd.f32 %v1201_v35, %v1200_v61 }
 0x8c9   : > { %v1145_v63 = vpop.xlane.xlu2 %1144  ;;  %v1142_v7 = vpop.xlane.xlu0 %1141 }
 0x8ca   : > { %v1167_v29 = vmul.f32 %v1145_v63, %v1093_v60  ;;  %v1173_v11 = vmul.f32 %v1145_v63, %v1137_v8  ;;  %v1166_v0 = vmul.f32 %v1142_v7, %v1093_v60  ;;  %v1172_v16 = vmul.f32 %v1142_v7, %v1137_v8 }
 0x8cc   : > { %v1169_v20 = vmul.f32 %v1167_v29, %v2771_v52  ;;  %v1168_v21 = vmul.f32 %v1166_v0, %v2771_v52  ;;  %v1175_v13 = vmul.f32 %v1173_v11, %v2777_v59  ;;  %v1174_v10 = vmul.f32 %v1172_v16, %v2777_v59 }
 0x8cd   : > { %v1218_v11 = vperm.slane %v1205_v32, 0  ;;  %v1207_v0 = vperm.slane %v1202_v62, 0 }
 0x8ce   : > { %v1171_v39 = vadd.f32 %v1169_v20, %v1165_v17  ;;  %v1170_v40 = vadd.f32 %v1168_v21, %v1164_v24 }
 0x8d0   : > { %v1177_v41 = vadd.f32 %v1175_v13, %v1171_v39  ;;  %v1176_v44 = vadd.f32 %v1174_v10, %v1170_v40 }
 0x8d2   : > { %v1181_v45 = vsel %vm667_vm0, %v1177_v41, -inf  ;;  %v1178_v48 = vsel %vm667_vm0, %v1176_v44, -inf }
 0x8d3   : > { %1182 = vmax.xlane.f32.xlu0 %v1181_v45  ;;  %1179 = vmax.xlane.f32.xlu1 %v1178_v48  ;;  %v1251_v48 = vpop.f32.mrf.mxu3 }
 0x946   : > { %v1180_v60 = vpop.xlane.xlu1 %1179  ;;  %v1183_v49 = vpop.xlane.xlu0 %1182 }
 0x947   : > { %v1184_v51 = vsub.f32 %v1176_v44, %v1180_v60  ;;  %v1185_v53 = vsub.f32 %v1177_v41, %v1183_v49 }
 0x949   : > { %v1186_v50 = vmul.f32 1.442695, %v1184_v51  ;;  %v1188_v54 = vmul.f32 1.442695, %v1185_v53 }
 0x94b   : > { %2343 = vpow2.f32 %v1186_v50 }
 0x94c   : > { %2345 = vpow2.f32 %v1188_v54 }
 0x951   : > { %v2344_v55 = vpop.eup %2343 }
 0x952   : > { %v2346_v1 = vpop.eup %2345  ;;  %v1190_v3 = vsel %vm667_vm0, %v2344_v55, 0.0 }
 0x953   : > { %1191 = vadd.xlane.f32.xlu2 %v1190_v3  ;;  %v1193_v56 = vsel %vm667_vm0, %v2346_v1, 0.0 }
 0x954   : > { %1194 = vadd.xlane.f32.xlu0 %v1193_v56 }
 0x9c6   : > { %v1192_v57 = vpop.xlane.xlu2 %1191 }
 0x9c7   : > { %2347 = vrcp.f32 %v1192_v57  ;;  %v1195_v14 = vpop.xlane.xlu0 %1194 }
 0x9c8   : > { %2349 = vrcp.f32 %v1195_v14 }
 0x9cd   : > { %v2348_v63 = vpop.eup %2347 }
 0x9ce   : > { %v2350_v7 = vpop.eup %2349  ;;  %v1198_v29 = vmul.f32 %v2348_v63, %v2344_v55 }
 0x9cf   : > { %v1199_v16 = vmul.f32 %v2350_v7, %v2346_v1  ;;  %v1254_v1 = vpop.f32.mrf.mxu3 }
 0x9d0   : > { %v1220_v17 = vmul.f32 %v1218_v11, %v1198_v29  ;;  %v1209_v20 = vmul.f32 %v1207_v0, %v1198_v29 }
 0x9d1   : > { %v1210_v8 = vmul.f32 %v1207_v0, %v1199_v16  ;;  %v1221_v10 = vmul.f32 %v1218_v11, %v1199_v16 }
 0x9d2   : > { %v1222_v21 = vsel %vm667_vm0, %v1220_v17, 0.0  ;;  %v1211_v24 = vsel %vm667_vm0, %v1209_v20, 0.0 }
 0x9d3   : > { %1223 = vadd.xlane.f32.xlu2 %v1222_v21  ;;  %1212 = vadd.xlane.f32.xlu1 %v1211_v24  ;;  %v1214_v13 = vsel %vm667_vm0, %v1210_v8, 0.0  ;;  %v1225_v39 = vsel %vm667_vm0, %v1221_v10, 0.0 }
 0x9d4   : > { %1215 = vadd.xlane.f32.xlu0 %v1214_v13 }
 0x9db   : > { %1226 = vadd.xlane.f32.xlu1 %v1225_v39 }
 0x9e8   : > { %1319 = vrot.lane.b32.xlu0 %v2874_v43, %s2535_s26 }
 0x9eb   : > { %1317 = vrot.lane.b32.xlu2 %v2871_v38, %s2535_s26 }
 0xa46   : > { %v1224_v40 = vpop.xlane.xlu2 %1223  ;;  %v1213_v41 = vpop.xlane.xlu1 %1212 }
 0xa47   : > { %v1230_v44 = vmul.f32 %v1224_v40, %v2849_v4  ;;  %v1228_v45 = vmul.f32 %v1213_v41, %v2847_v2  ;;  %v1216_v51 = vpop.xlane.xlu0 %1215 }
 0xa48   : > { %v1229_v55 = vmul.f32 %v1216_v51, %v2847_v2 }
 0xa49   : > { %v1232_v60 = vadd.f32 %v1230_v44, %v1228_v45 }
 0xa4b   : > { %v1257_v49 = vadd.f32 %v1251_v48, %v1232_v60 }
 0xa4d   : > { %v1259_v53 = vadd.f32 %v2856_v15, %v1257_v49 }
 0xa4e   : > { %v1227_v50 = vpop.xlane.xlu1 %1226  ;;  %v1318_v40 = vpop.permute.xlu2 %1317 }
 0xa4f   : > { %v2211_v54 = vmul.f32 -1.442695, %v1259_v53  ;;  %v1231_v43 = vmul.f32 %v1227_v50, %v2849_v4 }
 0xa51   : > { %2351 = vpow2.f32 %v2211_v54  ;;  %v1233_v38 = vadd.f32 %v1231_v43, %v1229_v55 }
 0xa53   : > { %v1258_v3 = vadd.f32 %v1254_v1, %v1233_v38 }
 0xa55   : > { %v1260_v56 = vadd.f32 %v2856_v15, %v1258_v3 }
 0xa57   : > { %v2352_v57 = vpop.eup %2351  ;;  %v2212_v58 = vmul.f32 -1.442695, %v1260_v56 }
 0xa58   : > { %v1267_v35 = vadd.f32 1.0, %v2352_v57 }
 0xa59   : > { %2353 = vpow2.f32 %v2212_v58 }
 0xa5a   : > { %2355 = vrcp.f32 %v1267_v35  ;;  %v1280_v63 = vand.u32 2147483648, %v1267_v35  ;;  %v1278_v29 = vand.u32 2147483647, %v1267_v35  ;;  %vm1274_vm9 = vweird.f32 %v1267_v35  ;;  %v1320_v54 = vpop.permute.xlu0 %1319 }
 0xa5c   : > { %v1281_v15 = vor.u32 1.1754944e-38, %v1280_v63  ;;  %vm1279_vm11 = vcmp.eq.f32.partialorder %v1278_v29, 8.507059e+37 }
 0xa5f   : > { %v2354_v14 = vpop.eup %2353 }
 0xa60   : > { %v2356_v25 = vpop.eup %2355  ;;  %v1268_v61 = vadd.f32 1.0, %v2354_v14 }
 0xa61   : > { %v1270_v32 = vmul.f32 %v2356_v25, %v1267_v35  ;;  %vm1275_vm8 = vweird.f32 %v2356_v25 }
 0xa62   : > { %2357 = vrcp.f32 %v1268_v61  ;;  %vm1276_vm10 = vmor %vm1274_vm9, %vm1275_vm8  ;;  %v1295_v24 = vand.u32 2147483648, %v1268_v61  ;;  %v1293_v39 = vand.u32 2147483647, %v1268_v61  ;;  %vm1289_vm14 = vweird.f32 %v1268_v61 }
 0xa63   : > { %v1271_v62 = vsub.f32 1.0, %v1270_v32 }
 0xa64   : > { %v1296_v48 = vor.u32 1.1754944e-38, %v1295_v24  ;;  %vm1294_vm1 = vcmp.eq.f32.partialorder %v1293_v39, 8.507059e+37 }
 0xa65   : > { %v1272_v7 = vmul.f32 %v2356_v25, %v1271_v62 }
 0xa67   : > { %v1273_v11 = vadd.f32 %v2356_v25, %v1272_v7 }
 0xa68   : > { %v2358_v0 = vpop.eup %2357 }
 0xa69   : > { %v1277_v16 = vsel %vm1276_vm10, %v2356_v25, %v1273_v11  ;;  %v1285_v17 = vmul.f32 %v2358_v0, %v1268_v61  ;;  %vm1290_vm13 = vweird.f32 %v2358_v0 }
 0xa6a   : > { %v1282_v20 = vsel %vm1279_vm11, %v1281_v15, %v1277_v16  ;;  %vm1291_vm15 = vmor %vm1289_vm14, %vm1290_vm13 }
 0xa6b   : > { %v1299_v8 = vmul.f32 2.0, %v1282_v20  ;;  %v1286_v21 = vsub.f32 1.0, %v1285_v17 }
 0xa6d   : > { %v2213_v13 = vadd.f32 -1.0, %v1299_v8  ;;  %v1287_v10 = vmul.f32 %v2358_v0, %v1286_v21 }
 0xa6f   : > { %v1303_v41 = vsel %vm661_vm7, %v1282_v20, %v2213_v13  ;;  %v1288_v44 = vadd.f32 %v2358_v0, %v1287_v10 }
 0xa70   : > { %v1323_v45 = vmul.f32 %v1318_v40, %v1303_v41  ;;  %1307 = vrot.lane.b32.xlu1 %v1303_v41, %s2535_s26 }
 0xa71   : > { %v1292_v60 = vsel %vm1291_vm15, %v2358_v0, %v1288_v44 }
 0xa72   : > { %v1297_v49 = vsel %vm1294_vm1, %v1296_v48, %v1292_v60  ;;  %1327 = vrot.lane.b32.xlu0 %v1323_v45, %s2536_s29 }
 0xa73   : > { %v1300_v51 = vmul.f32 2.0, %v1297_v49 }
 0xa75   : > { %v2214_v53 = vadd.f32 -1.0, %v1300_v51 }
 0xa77   : > { %v1304_v50 = vsel %vm661_vm7, %v1297_v49, %v2214_v53 }
 0xa78   : > { %v1324_v55 = vmul.f32 %v1320_v54, %v1304_v50  ;;  %1309 = vrot.lane.b32.xlu2 %v1304_v50, %s2535_s26 }
 0xa7a   : > { %1329 = vrot.lane.b32.xlu1 %v1324_v55, %s2536_s29 }
 0xa82   : > { %1349 = vrot.lane.b32.xlu1 %v2920_v19, %s2537_s17 }
 0xad2   : > { %v1310_v56 = vpop.permute.xlu2 %1309 }
 0xad3   : > { %v1314_v57 = vmul.f32 %v1310_v56, %v1304_v50 }
 0xae2   : > { %v1308_v43 = vpop.permute.xlu1 %1307 }
 0xae3   : > { %v1313_v38 = vmul.f32 %v1308_v43, %v1303_v41 }
 0xae4   : > { %v1328_v1 = vpop.permute.xlu0 %1327 }
 0xae5   : > { %v3012_v3 = vadd.f32 %v1328_v1, %v1313_v38 }
 0xae7   : > { %2359 = vtanh.f32 %v3012_v3 }
 0xaec   : > { %v1330_v58 = vpop.permute.xlu1 %1329 }
 0xaed   : > { %v2360_v35 = vpop.eup %2359  ;;  %v3015_v14 = vadd.f32 %v1330_v58, %v1314_v57 }
 0xaee   : > { %1339 = vrot.lane.b32.xlu0 %v2360_v35, %s2537_s17 }
 0xaef   : > { %2361 = vtanh.f32 %v3015_v14 }
 0xaf4   : > { %v1350_v25 = vpop.permute.xlu1 %1349 }
 0xaf5   : > { %v2362_v61 = vpop.eup %2361  ;;  %2215 = vmatmul.msk.f32.vlgmr.msrb.gmra.mxu0 %vm803_vm12, %v1350_v25 }
 0xaf6   : > { %1341 = vrot.lane.b32.xlu2 %v2362_v61, %s2537_s17 }
 0xafe   : > { %1351 = vrot.lane.b32.xlu2 %v2925_v22, %s2537_s17 }
 0xb06   : > { %1473 = vrot.lane.b32.xlu2 %v2913_v12, %s2535_s26 }
 0xb50   : > { %v1342_v19 = vpop.permute.xlu2 %1341 }
 0xb51   : > { %v1346_v32 = vmul.f32 %v1342_v19, %v1304_v50 }
 0xb53   : > { %1384 = vrot.lane.b32.xlu1 %v1346_v32, %s2537_s17 }
 0xb58   : > { %v1352_v62 = vpop.permute.xlu2 %1351 }
 0xb59   : > { %2216 = vmatmul.msk.f32.gmra.mxu0 %vm803_vm12, %v1352_v62 }
 0xb60   : > { %v1340_v63 = vpop.permute.xlu0 %1339 }
 0xb61   : > { %v1345_v7 = vmul.f32 %v1340_v63, %v1303_v41 }
 0xb63   : > { %1382 = vrot.lane.b32.xlu0 %v1345_v7, %s2537_s17 }
 0xb6b   : > { %1471 = vrot.lane.b32.xlu0 %v2910_v5, %s2535_s26 }
 0xb72   : > { %v1374_v22 = vpop.f32.mrf.mxu0 }
 0xbc5   : > { %v1385_v12 = vpop.permute.xlu1 %1384 }
 0xbd5   : > { %v1383_v29 = vpop.permute.xlu0 %1382 }
 0xbd6   : > { %2217 = vmatmul.msk.f32.vlgmr.msra.gmra.mxu1 %vm803_vm12, %v1383_v29  ;;  %2223 = vmatmul.msk.f32.vlgmr.msrb.gmra.mxu2 %vm803_vm12, %v1383_v29  ;;  %v1377_v17 = vpop.f32.mrf.mxu0  ;;  %v1474_v29 = vpop.permute.xlu2 %1473 }
 0xbdd   : > { %v1472_v58 = vpop.permute.xlu0 %1471 }
 0xbde   : > { %2218 = vmatmul.msk.f32.gmra.mxu1 %vm803_vm12, %v1385_v12  ;;  %2224 = vmatmul.msk.f32.gmra.mxu2 %vm803_vm12, %v1385_v12 }
 0xc53   : > { %v1407_v11 = vpop.f32.mrf.mxu1 }
 0xc54   : > { %v1408_v0 = vadd.f32 %v1407_v11, %v1374_v22 }
 0xc56   : > { %v1413_v15 = vadd.f32 %v2894_v27, %v1408_v0 }
 0xc58   : > { %v2219_v16 = vmul.f32 -1.442695, %v1413_v15 }
 0xc5a   : > { %2363 = vpow2.f32 %v2219_v16 }
 0xc5b   : > { %v1410_v20 = vpop.f32.mrf.mxu1 }
 0xc5c   : > { %v1411_v5 = vadd.f32 %v1410_v20, %v1377_v17 }
 0xc5e   : > { %v1414_v8 = vadd.f32 %v2894_v27, %v1411_v5 }
 0xc60   : > { %v2364_v21 = vpop.eup %2363  ;;  %v2220_v24 = vmul.f32 -1.442695, %v1414_v8 }
 0xc61   : > { %v1421_v13 = vadd.f32 1.0, %v2364_v21 }
 0xc62   : > { %2365 = vpow2.f32 %v2220_v24 }
 0xc63   : > { %2367 = vrcp.f32 %v1421_v13  ;;  %v1434_v45 = vand.u32 2147483648, %v1421_v13  ;;  %v1432_v60 = vand.u32 2147483647, %v1421_v13  ;;  %vm1428_vm3 = vweird.f32 %v1421_v13 }
 0xc65   : > { %v1435_v27 = vor.u32 1.1754944e-38, %v1434_v45  ;;  %vm1433_vm5 = vcmp.eq.f32.partialorder %v1432_v60, 8.507059e+37 }
 0xc68   : > { %v2366_v10 = vpop.eup %2365 }
 0xc69   : > { %v2368_v39 = vpop.eup %2367  ;;  %v1422_v40 = vadd.f32 1.0, %v2366_v10 }
 0xc6a   : > { %v1424_v41 = vmul.f32 %v2368_v39, %v1421_v13  ;;  %vm1429_vm2 = vweird.f32 %v2368_v39 }
 0xc6b   : > { %2369 = vrcp.f32 %v1422_v40  ;;  %vm1430_vm4 = vmor %vm1428_vm3, %vm1429_vm2  ;;  %v1449_v38 = vand.u32 2147483648, %v1422_v40  ;;  %v1447_v57 = vand.u32 2147483647, %v1422_v40  ;;  %vm1443_vm9 = vweird.f32 %v1422_v40 }
 0xc6c   : > { %v1425_v44 = vsub.f32 1.0, %v1424_v41 }
 0xc6d   : > { %v1450_v19 = vor.u32 1.1754944e-38, %v1449_v38  ;;  %vm1448_vm11 = vcmp.eq.f32.partialorder %v1447_v57, 8.507059e+37 }
 0xc6e   : > { %v1426_v48 = vmul.f32 %v2368_v39, %v1425_v44 }
 0xc70   : > { %v1427_v49 = vadd.f32 %v2368_v39, %v1426_v48 }
 0xc71   : > { %v2370_v51 = vpop.eup %2369 }
 0xc72   : > { %v1431_v53 = vsel %vm1430_vm4, %v2368_v39, %v1427_v49  ;;  %v1439_v50 = vmul.f32 %v2370_v51, %v1422_v40  ;;  %vm1444_vm8 = vweird.f32 %v2370_v51 }
 0xc73   : > { %v1436_v54 = vsel %vm1433_vm5, %v1435_v27, %v1431_v53  ;;  %vm1445_vm10 = vmor %vm1443_vm9, %vm1444_vm8 }
 0xc74   : > { %v1453_v55 = vmul.f32 2.0, %v1436_v54  ;;  %v1440_v43 = vsub.f32 1.0, %v1439_v50 }
 0xc76   : > { %v2221_v1 = vadd.f32 -1.0, %v1453_v55  ;;  %v1441_v56 = vmul.f32 %v2370_v51, %v1440_v43 }
 0xc78   : > { %v1457_v35 = vsel %vm661_vm7, %v1436_v54, %v2221_v1  ;;  %v1442_v25 = vadd.f32 %v2370_v51, %v1441_v56 }
 0xc79   : > { %1461 = vrot.lane.b32.xlu1 %v1457_v35, %s2535_s26  ;;  %v1477_v61 = vmul.f32 %v1472_v58, %v1457_v35 }
 0xc7a   : > { %v1446_v32 = vsel %vm1445_vm10, %v2370_v51, %v1442_v25 }
 0xc7b   : > { %1481 = vrot.lane.b32.xlu2 %v1477_v61, %s2536_s29  ;;  %v1451_v62 = vsel %vm1448_vm11, %v1450_v19, %v1446_v32 }
 0xc7c   : > { %v1454_v63 = vmul.f32 2.0, %v1451_v62 }
 0xc7e   : > { %v2222_v7 = vadd.f32 -1.0, %v1454_v63 }
 0xc80   : > { %v1458_v12 = vsel %vm661_vm7, %v1451_v62, %v2222_v7  ;;  %v3077_v62 = vld [vmem:[%s2698_s30 + $0x8] sm:$0xff]  ;;  %v3082_v7 = vld [vmem:[%s2698_s30] sm:$0xff] }
 0xc81   : > { %1463 = vrot.lane.b32.xlu0 %v1458_v12, %s2535_s26  ;;  %v1478_v22 = vmul.f32 %v1474_v29, %v1458_v12 }
 0xc83   : > { %1483 = vrot.lane.b32.xlu1 %v1478_v22, %s2536_s29 }
 0xcd5   : > { %v1482_v15 = vpop.permute.xlu2 %1481 }
 0xceb   : > { %v1462_v11 = vpop.permute.xlu1 %1461 }
 0xcec   : > { %v1467_v0 = vmul.f32 %v1462_v11, %v1457_v35 }
 0xcee   : > { %v3044_v16 = vadd.f32 %v1482_v15, %v1467_v0 }
 0xcf0   : > { %2371 = vtanh.f32 %v3044_v16 }
 0xcf3   : > { %v1464_v17 = vpop.permute.xlu0 %1463 }
 0xcf4   : > { %v1468_v20 = vmul.f32 %v1464_v17, %v1458_v12  ;;  %v3090_v17 = vld [vmem:[%s2727_s25 + $0x8] sm:$0xff] }
 0xcf5   : > { %v1484_v5 = vpop.permute.xlu1 %1483 }
 0xcf6   : > { %v2372_v8 = vpop.eup %2371  ;;  %v3047_v21 = vadd.f32 %v1484_v5, %v1468_v20  ;;  %v3094_v5 = vld [vmem:[%s2727_s25] sm:$0xff] }
 0xcf7   : > { %1493 = vrot.lane.b32.xlu0 %v2372_v8, %s2537_s17 }
 0xcf8   : > { %2373 = vtanh.f32 %v3047_v21 }
 0xcfe   : > { %v2374_v24 = vpop.eup %2373 }
 0xcff   : > { %1495 = vrot.lane.b32.xlu2 %v2374_v24, %s2537_s17 }
 0xd59   : > { %v1496_v13 = vpop.permute.xlu2 %1495 }
 0xd5a   : > { %v3052_v10 = vmul.f32 %v1496_v13, %v1458_v12 }
 0xd5c   : > { %v1502_v39 = vmul.f32 %v3052_v10, %v2918_v18 }
 0xd5e   : > { %1507 = vrot.lane.b32.xlu0 %v1502_v39, %s2537_s17 }
 0xd69   : > { %v1494_v40 = vpop.permute.xlu0 %1493 }
 0xd6a   : > { %v3057_v41 = vmul.f32 %v1494_v40, %v1457_v35 }
 0xd6c   : > { %v1501_v44 = vmul.f32 %v3057_v41, %v2918_v18 }
 0xd6e   : > { %1505 = vrot.lane.b32.xlu1 %v1501_v44, %s2537_s17 }
 0xdd0   : > { %v1508_v45 = vpop.permute.xlu0 %1507 }
 0xdd1   : > { %v1514_v48 = vsel %vm803_vm12, %v1508_v45, 0.0 }
 0xdd2   : > { %1515 = vadd.xlane.f32.xlu1 %v1514_v48 }
 0xde0   : > { %v1506_v60 = vpop.permute.xlu1 %1505 }
 0xde1   : > { %v1511_v49 = vsel %vm803_vm12, %v1506_v60, 0.0 }
 0xde2   : > { %1512 = vadd.xlane.f32.xlu2 %v1511_v49 }
 0xe45   : > { %v1516_v51 = vpop.xlane.xlu1 %1515 }
 0xe46   : > { %v1518_v27 = vadd.f32 %v1516_v51, %v2932_v42 }
 0xe48   : > { %v1520_v50 = vmul.f32 %v2746_v33, %v1518_v27  ;;  %v1531_v44 = vsub.f32 %v2959_v9, %v1518_v27 }
 0xe4a   : > { %v1522_v43 = vsel %vm667_vm0, %v1520_v50, 0.0 }
 0xe55   : > { %v1513_v53 = vpop.xlane.xlu2 %1512 }
 0xe56   : > { %v1517_v54 = vadd.f32 %v1513_v53, %v2932_v42 }
 0xe58   : > { %v1519_v55 = vmul.f32 %v2749_v34, %v1517_v54  ;;  %v1530_v11 = vsub.f32 %v2949_v6, %v1517_v54 }
 0xe5a   : > { %v1521_v38 = vsel %vm667_vm0, %v1519_v55, 0.0 }
 0xe5b   : > { %v1523_v1 = vadd.f32 %v1522_v43, %v1521_v38 }
 0xe5d   : > { %v1524_v56 = vrot.slane %v1523_v1, 4 }
 0xe5f   : > { %v1525_v57 = vadd.f32 %v1524_v56, %v1523_v1 }
 0xe61   : > { %v1526_v58 = vrot.slane %v1525_v57, 2 }
 0xe63   : > { %v1527_v35 = vadd.f32 %v1526_v58, %v1525_v57 }
 0xe65   : > { %v1528_v25 = vrot.slane %v1527_v35, 1 }
 0xe67   : > { %v1529_v61 = vadd.f32 %v1528_v25, %v1527_v35 }
 0xe69   : > { %v3071_v19 = vsub.f32 %v2941_v26, %v1529_v61 }
 0xe6b   : > { %v3074_v32 = vperm.slane %v3071_v19, 0 }
 0xe6d   : > { %v1537_v63 = vmul.f32 %v3077_v62, %v3074_v32  ;;  %v1536_v29 = vmul.f32 %v3082_v7, %v3074_v32 }
 0xe6f   : > { %v1541_v12 = vsel %vm667_vm0, %v1537_v63, 0.0  ;;  %v1538_v22 = vsel %vm667_vm0, %v1536_v29, 0.0 }
 0xe70   : > { %1542 = vadd.xlane.f32.xlu2 %v1541_v12  ;;  %1539 = vadd.xlane.f32.xlu0 %v1538_v22 }
 0xe88   : > { %1588 = vperm.xlu2 %2305, %v1530_v11  }
 0xee3   : > { %v1543_v0 = vpop.xlane.xlu2 %1542  ;;  %v1540_v15 = vpop.xlane.xlu0 %1539 }
 0xee4   : > { %v1545_v20 = vsub.f32 %v1543_v0, %v3090_v17  ;;  %v1544_v8 = vsub.f32 %v1540_v15, %v3094_v5 }
 0xee6   : > { %v1547_v24 = vmul.f32 %v1545_v20, %v1545_v20  ;;  %v1546_v13 = vmul.f32 %v1544_v8, %v1544_v8  ;;  %1564 = vperm.xlu0 %2306, %v1545_v20   ;;  %1559 = vperm.xlu1 %2304, %v1544_v8  }
 0xee8   : > { %v1549_v39 = vsel %vm1107_vm6, %v1547_v24, 0.0  ;;  %v1548_v40 = vsel %vm1107_vm6, %v1546_v13, 0.0 }
 0xee9   : > { %v3099_v6 = vadd.f32 %v1549_v39, %v1548_v40 }
 0xeeb   : > { %v1589_v35 = vpop.permute.xlu2 %1588 }
 0xeec   : > { %v1596_v29 = vmul.f32 %v1589_v35, %v3074_v32 }
 0xeee   : > { %1593 = vperm.xlu1 %2304, %v1531_v44   ;;  %v1598_v0 = vmul.f32 %v1596_v29, %v2763_v46 }
 0xf58   : > { %v1560_v45 = vpop.permute.xlu1 %1559  ;;  %v1565_v48 = vpop.permute.xlu0 %1564 }
 0xf59   : > { %v1567_v60 = vmul.f32 %v3082_v7, %v1560_v45  ;;  %v1568_v49 = vmul.f32 %v3077_v62, %v1565_v48 }
 0xf5b   : > { %v1569_v51 = vsel %vm667_vm0, %v1567_v60, 0.0  ;;  %v1570_v53 = vsel %vm667_vm0, %v1568_v49, 0.0 }
 0xf5c   : > { %v1571_v50 = vadd.f32 %v1570_v53, %v1569_v51 }
 0xf5e   : > { %v1572_v54 = vrot.slane %v1571_v50, 4 }
 0xf60   : > { %v1573_v55 = vadd.f32 %v1572_v54, %v1571_v50  ;;  %v1594_v25 = vpop.permute.xlu1 %1593 }
 0xf61   : > { %v1597_v12 = vmul.f32 %v1594_v25, %v3074_v32 }
 0xf62   : > { %v1574_v43 = vrot.slane %v1573_v55, 2 }
 0xf63   : > { %v1599_v15 = vmul.f32 %v1597_v12, %v2763_v46  ;;  %v1643_v12 = vmul.f32 %v3071_v19, %v2828_v36 }
 0xf64   : > { %v1575_v38 = vadd.f32 %v1574_v43, %v1573_v55 }
 0xf66   : > { %v1576_v1 = vrot.slane %v1575_v38, 1 }
 0xf68   : > { %v1577_v56 = vadd.f32 %v1576_v1, %v1575_v38 }
 0xf6a   : > { %v1579_v9 = vmul.f32 %v2746_v33, %v1577_v56  ;;  %v1578_v27 = vmul.f32 %v2749_v34, %v1577_v56  ;;  %v1601_v61 = vmul.f32 %v1594_v25, %v1577_v56  ;;  %v1600_v63 = vmul.f32 %v1589_v35, %v1577_v56 }
 0xf6c   : > { %v1583_v57 = vsel %vm667_vm0, %v1579_v9, 0.0  ;;  %v1580_v58 = vsel %vm667_vm0, %v1578_v27, 0.0  ;;  %v1603_v22 = vmul.f32 %v1601_v61, %v2765_v47  ;;  %v1602_v11 = vmul.f32 %v1600_v63, %v2765_v47 }
 0xf6d   : > { %1584 = vadd.xlane.f32.xlu2 %v1583_v57  ;;  %1581 = vadd.xlane.f32.xlu0 %v1580_v58  ;;  %v1644_v61 = vmul.f32 %v1577_v56, %v2830_v37  ;;  %v1641_v63 = vmul.f32 %v1577_v56, %v2826_v31 }
 0xf6e   : > { %v1605_v44 = vadd.f32 %v1603_v22, %v1599_v15  ;;  %v1604_v60 = vadd.f32 %v1602_v11, %v1598_v0  ;;  %v1640_v22 = vmul.f32 %v3071_v19, %v2824_v30 }
 0xf6f   : > { %v1645_v11 = vadd.f32 %v1644_v61, %v1643_v12 }
 0xf70   : > { %v1642_v0 = vadd.f32 %v1641_v63, %v1640_v22 }
 0xfe0   : > { %v1585_v20 = vpop.xlane.xlu2 %1584  ;;  %v1582_v8 = vpop.xlane.xlu0 %1581 }
 0xfe1   : > { %v1607_v24 = vmul.f32 %v1585_v20, %v3074_v32  ;;  %v1613_v13 = vmul.f32 %v1585_v20, %v1577_v56  ;;  %v1606_v39 = vmul.f32 %v1582_v8, %v3074_v32  ;;  %v1612_v40 = vmul.f32 %v1582_v8, %v1577_v56 }
 0xfe3   : > { %v1609_v45 = vmul.f32 %v1607_v24, %v2771_v52  ;;  %v1608_v48 = vmul.f32 %v1606_v39, %v2771_v52  ;;  %v1615_v47 = vmul.f32 %v1613_v13, %v2777_v59  ;;  %v1614_v49 = vmul.f32 %v1612_v40, %v2777_v59 }
 0xfe4   : > { %v1658_v24 = vperm.slane %v1645_v11, 0  ;;  %v1647_v13 = vperm.slane %v1642_v0, 0 }
 0xfe5   : > { %v1611_v51 = vadd.f32 %v1609_v45, %v1605_v44  ;;  %v1610_v46 = vadd.f32 %v1608_v48, %v1604_v60 }
 0xfe7   : > { %v1617_v53 = vadd.f32 %v1615_v47, %v1611_v51  ;;  %v1616_v50 = vadd.f32 %v1614_v49, %v1610_v46  ;;  %v1691_v51 = vpop.f32.mrf.mxu2 }
 0xfe9   : > { %v1621_v54 = vsel %vm667_vm0, %v1617_v53, -inf  ;;  %v1618_v55 = vsel %vm667_vm0, %v1616_v50, -inf }
 0xfea   : > { %1622 = vmax.xlane.f32.xlu0 %v1621_v54  ;;  %1619 = vmax.xlane.f32.xlu1 %v1618_v55  ;;  %v2411_v54 = vld [vmem:[%s3231_s8] ss:$0 sm:$0xff] }
0x105d   : > { %v1620_v43 = vpop.xlane.xlu1 %1619  ;;  %v1623_v38 = vpop.xlane.xlu0 %1622 }
0x105e   : > { %v1624_v1 = vsub.f32 %v1616_v50, %v1620_v43  ;;  %v1625_v9 = vsub.f32 %v1617_v53, %v1623_v38 }
0x1060   : > { %v1626_v52 = vmul.f32 1.442695, %v1624_v1  ;;  %v1628_v27 = vmul.f32 1.442695, %v1625_v9  ;;  %v1694_v9 = vpop.f32.mrf.mxu2 }
0x1062   : > { %2375 = vpow2.f32 %v1626_v52 }
0x1063   : > { %2377 = vpow2.f32 %v1628_v27 }
0x1068   : > { %v2376_v57 = vpop.eup %2375 }
0x1069   : > { %v2378_v59 = vpop.eup %2377  ;;  %v1630_v58 = vsel %vm667_vm0, %v2376_v57, 0.0 }
0x106a   : > { %1631 = vadd.xlane.f32.xlu2 %v1630_v58  ;;  %v1633_v35 = vsel %vm667_vm0, %v2378_v59, 0.0 }
0x106b   : > { %1634 = vadd.xlane.f32.xlu0 %v1633_v35 }
0x10dd   : > { %v1632_v25 = vpop.xlane.xlu2 %1631 }
0x10de   : > { %2379 = vrcp.f32 %v1632_v25  ;;  %v1635_v29 = vpop.xlane.xlu0 %1634 }
0x10df   : > { %2381 = vrcp.f32 %v1635_v29 }
0x10e4   : > { %v2380_v15 = vpop.eup %2379 }
0x10e5   : > { %v2382_v20 = vpop.eup %2381  ;;  %v1638_v8 = vmul.f32 %v2380_v15, %v2376_v57 }
0x10e6   : > { %v1639_v39 = vmul.f32 %v2382_v20, %v2378_v59 }
0x10e7   : > { %v1660_v37 = vmul.f32 %v1658_v24, %v1638_v8  ;;  %v1649_v40 = vmul.f32 %v1647_v13, %v1638_v8 }
0x10e8   : > { %v1650_v31 = vmul.f32 %v1647_v13, %v1639_v39  ;;  %v1661_v30 = vmul.f32 %v1658_v24, %v1639_v39 }
0x10e9   : > { %v1662_v56 = vsel %vm667_vm0, %v1660_v37, 0.0  ;;  %v1651_v44 = vsel %vm667_vm0, %v1649_v40, 0.0 }
0x10ea   : > { %1663 = vadd.xlane.f32.xlu1 %v1662_v56  ;;  %1652 = vadd.xlane.f32.xlu2 %v1651_v44  ;;  %v1654_v36 = vsel %vm667_vm0, %v1650_v31, 0.0  ;;  %v1665_v45 = vsel %vm667_vm0, %v1661_v30, 0.0 }
0x10eb   : > { %1655 = vadd.xlane.f32.xlu0 %v1654_v36 }
0x10f2   : > { %1666 = vadd.xlane.f32.xlu2 %v1665_v45 }
0x10ff   : > { %1759 = vrot.lane.b32.xlu0 %v3015_v14, %s2535_s26 }
0x1103   : > { %1757 = vrot.lane.b32.xlu1 %v3012_v3, %s2535_s26 }
0x115d   : > { %v1664_v48 = vpop.xlane.xlu1 %1663  ;;  %v1653_v60 = vpop.xlane.xlu2 %1652 }
0x115e   : > { %v1670_v47 = vmul.f32 %v1664_v48, %v2849_v4  ;;  %v1668_v49 = vmul.f32 %v1653_v60, %v2847_v2  ;;  %v1656_v50 = vpop.xlane.xlu0 %1655 }
0x115f   : > { %v1669_v38 = vmul.f32 %v1656_v50, %v2847_v2 }
0x1160   : > { %v1672_v46 = vadd.f32 %v1670_v47, %v1668_v49 }
0x1162   : > { %v1697_v53 = vadd.f32 %v1691_v51, %v1672_v46 }
0x1164   : > { %v1699_v55 = vadd.f32 %v2411_v54, %v1697_v53 }
0x1165   : > { %v1667_v43 = vpop.xlane.xlu2 %1666 }
0x1166   : > { %v2225_v14 = vmul.f32 -1.442695, %v1699_v55  ;;  %v1671_v3 = vmul.f32 %v1667_v43, %v2849_v4 }
0x1168   : > { %2383 = vpow2.f32 %v2225_v14  ;;  %v1673_v1 = vadd.f32 %v1671_v3, %v1669_v38 }
0x116a   : > { %v1698_v52 = vadd.f32 %v1694_v9, %v1673_v1 }
0x116c   : > { %v1700_v27 = vadd.f32 %v2411_v54, %v1698_v52 }
0x116e   : > { %v2384_v57 = vpop.eup %2383  ;;  %v2226_v59 = vmul.f32 -1.442695, %v1700_v27 }
0x116f   : > { %v1707_v58 = vadd.f32 1.0, %v2384_v57 }
0x1170   : > { %2385 = vpow2.f32 %v2226_v59 }
0x1171   : > { %2387 = vrcp.f32 %v1707_v58  ;;  %v1720_v12 = vand.u32 2147483648, %v1707_v58  ;;  %v1718_v4 = vand.u32 2147483647, %v1707_v58  ;;  %vm1714_vm14 = vweird.f32 %v1707_v58  ;;  %v1760_v46 = vpop.permute.xlu0 %1759 }
0x1173   : > { %v1721_v0 = vor.u32 1.1754944e-38, %v1720_v12  ;;  %vm1719_vm1 = vcmp.eq.f32.partialorder %v1718_v4, 8.507059e+37 }
0x1175   : > { %v1758_v44 = vpop.permute.xlu1 %1757 }
0x1176   : > { %v2386_v35 = vpop.eup %2385 }
0x1177   : > { %v2388_v25 = vpop.eup %2387  ;;  %v1708_v61 = vadd.f32 1.0, %v2386_v35 }
0x1178   : > { %v1710_v63 = vmul.f32 %v2388_v25, %v1707_v58  ;;  %vm1715_vm13 = vweird.f32 %v2388_v25 }
0x1179   : > { %2389 = vrcp.f32 %v1708_v61  ;;  %vm1716_vm15 = vmor %vm1714_vm14, %vm1715_vm13  ;;  %v1735_v39 = vand.u32 2147483648, %v1708_v61  ;;  %v1733_v40 = vand.u32 2147483647, %v1708_v61  ;;  %vm1729_vm3 = vweird.f32 %v1708_v61 }
0x117a   : > { %v1711_v29 = vsub.f32 1.0, %v1710_v63 }
0x117b   : > { %v1736_v30 = vor.u32 1.1754944e-38, %v1735_v39  ;;  %vm1734_vm5 = vcmp.eq.f32.partialorder %v1733_v40, 8.507059e+37 }
0x117c   : > { %v1712_v2 = vmul.f32 %v2388_v25, %v1711_v29  ;;  %v2412_v29 = vld [vmem:[%s3232_s9] ss:$0 sm:$0xff] }
0x117e   : > { %v1713_v22 = vadd.f32 %v2388_v25, %v1712_v2 }
0x117f   : > { %v2390_v11 = vpop.eup %2389 }
0x1180   : > { %v1725_v15 = vmul.f32 %v2390_v11, %v1708_v61  ;;  %v1717_v20 = vsel %vm1716_vm15, %v2388_v25, %v1713_v22  ;;  %vm1730_vm2 = vweird.f32 %v2390_v11 }
0x1181   : > { %v1722_v8 = vsel %vm1719_vm1, %v1721_v0, %v1717_v20  ;;  %vm1731_vm4 = vmor %vm1729_vm3, %vm1730_vm2  ;;  %vm1999_vm2 = vcmask 124928   ;;  %vm2012_vm3 = vcmask 16384  }
0x1182   : > { %v1726_v24 = vsub.f32 1.0, %v1725_v15  ;;  %v1739_v13 = vmul.f32 2.0, %v1722_v8 }
0x1184   : > { %v1727_v37 = vmul.f32 %v2390_v11, %v1726_v24  ;;  %v2227_v31 = vadd.f32 -1.0, %v1739_v13 }
0x1186   : > { %v1728_v56 = vadd.f32 %v2390_v11, %v1727_v37  ;;  %v1743_v36 = vsel %vm661_vm7, %v1722_v8, %v2227_v31 }
0x1187   : > { %v1763_v45 = vmul.f32 %v1758_v44, %v1743_v36  ;;  %1747 = vrot.lane.b32.xlu2 %v1743_v36, %s2535_s26 }
0x1188   : > { %v1732_v48 = vsel %vm1731_vm4, %v2390_v11, %v1728_v56 }
0x1189   : > { %v1737_v60 = vsel %vm1734_vm5, %v1736_v30, %v1732_v48  ;;  %1767 = vrot.lane.b32.xlu0 %v1763_v45, %s2536_s29 }
0x118a   : > { %v1740_v47 = vmul.f32 2.0, %v1737_v60 }
0x118c   : > { %v2228_v49 = vadd.f32 -1.0, %v1740_v47 }
0x118e   : > { %v1744_v51 = vsel %vm661_vm7, %v1737_v60, %v2228_v49 }
0x118f   : > { %v1764_v53 = vmul.f32 %v1760_v46, %v1744_v51  ;;  %1749 = vrot.lane.b32.xlu1 %v1744_v51, %s2535_s26 }
0x1191   : > { %1769 = vrot.lane.b32.xlu2 %v1764_v53, %s2536_s29 }
0x1199   : > { %1789 = vrot.lane.b32.xlu2 %v3057_v41, %s2537_s17 }
0x11e1   : > { %v1748_v50 = vpop.permute.xlu2 %1747 }
0x11e2   : > { %v1753_v43 = vmul.f32 %v1748_v50, %v1743_v36 }
0x11eb   : > { %v1770_v54 = vpop.permute.xlu2 %1769 }
0x11f3   : > { %v1790_v55 = vpop.permute.xlu2 %1789 }
0x11f4   : > { %2229 = vmatmul.msk.f32.vlgmr.msrb.gmra.mxu3 %vm803_vm12, %v1790_v55 }
0x11fb   : > { %v1768_v14 = vpop.permute.xlu0 %1767 }
0x11fc   : > { %v1773_v38 = vadd.f32 %v1768_v14, %v1753_v43 }
0x11fe   : > { %2391 = vtanh.f32 %v1773_v38 }
0x1201   : > { %v1750_v3 = vpop.permute.xlu1 %1749 }
0x1202   : > { %v1754_v1 = vmul.f32 %v1750_v3, %v1744_v51 }
0x1204   : > { %v2392_v9 = vpop.eup %2391  ;;  %v1774_v52 = vadd.f32 %v1770_v54, %v1754_v1 }
0x1205   : > { %1779 = vrot.lane.b32.xlu0 %v2392_v9, %s2537_s17 }
0x1206   : > { %2393 = vtanh.f32 %v1774_v52 }
0x120c   : > { %v2394_v27 = vpop.eup %2393 }
0x120d   : > { %1781 = vrot.lane.b32.xlu1 %v2394_v27, %s2537_s17 }
0x1215   : > { %1791 = vrot.lane.b32.xlu1 %v3052_v10, %s2537_s17 }
0x121d   : > { %1913 = vrot.lane.b32.xlu1 %v3047_v21, %s2535_s26 }
0x1277   : > { %v1780_v41 = vpop.permute.xlu0 %1779  ;;  %v1814_v21 = vpop.f32.mrf.mxu3 }
0x1278   : > { %v1785_v57 = vmul.f32 %v1780_v41, %v1743_v36 }
0x127a   : > { %1822 = vrot.lane.b32.xlu0 %v1785_v57, %s2537_s17 }
0x127f   : > { %v1782_v59 = vpop.permute.xlu1 %1781 }
0x1280   : > { %v1786_v58 = vmul.f32 %v1782_v59, %v1744_v51 }
0x1282   : > { %1824 = vrot.lane.b32.xlu2 %v1786_v58, %s2537_s17  ;;  %1911 = vrot.lane.b32.xlu0 %v3044_v16, %s2535_s26 }
0x1287   : > { %v1792_v35 = vpop.permute.xlu1 %1791 }
0x1288   : > { %2230 = vmatmul.msk.f32.gmra.mxu3 %vm803_vm12, %v1792_v35 }
0x128f   : > { %v1914_v27 = vpop.permute.xlu1 %1913 }
0x12dc   : > { %v1825_v10 = vpop.permute.xlu2 %1824 }
0x12ec   : > { %v1823_v25 = vpop.permute.xlu0 %1822 }
0x12ed   : > { %2231 = vmatmul.msk.f32.vlgmr.msra.gmra.mxu0 %vm803_vm12, %v1823_v25 }
0x12f4   : > { %v1912_v54 = vpop.permute.xlu0 %1911 }
0x12f5   : > { %2232 = vmatmul.msk.f32.gmra.mxu0 %vm803_vm12, %v1825_v10 }
0x130b   : > { %v1817_v16 = vpop.f32.mrf.mxu3 }
0x136a   : > { %v1847_v61 = vpop.f32.mrf.mxu0 }
0x136b   : > { %v1848_v63 = vadd.f32 %v1847_v61, %v1814_v21 }
0x136d   : > { %v1853_v12 = vadd.f32 %v2412_v29, %v1848_v63 }
0x136f   : > { %v2233_v2 = vmul.f32 -1.442695, %v1853_v12 }
0x1371   : > { %2395 = vpow2.f32 %v2233_v2 }
0x1372   : > { %v1850_v4 = vpop.f32.mrf.mxu0 }
0x1373   : > { %v1851_v22 = vadd.f32 %v1850_v4, %v1817_v16 }
0x1375   : > { %v1854_v11 = vadd.f32 %v2412_v29, %v1851_v22 }
0x1377   : > { %v2396_v0 = vpop.eup %2395  ;;  %v2234_v15 = vmul.f32 -1.442695, %v1854_v11 }
0x1378   : > { %v1861_v20 = vadd.f32 1.0, %v2396_v0 }
0x1379   : > { %2397 = vpow2.f32 %v2234_v15 }
0x137a   : > { %2399 = vrcp.f32 %v1861_v20  ;;  %v1874_v40 = vand.u32 2147483648, %v1861_v20  ;;  %v1872_v56 = vand.u32 2147483647, %v1861_v20  ;;  %vm1868_vm9 = vweird.f32 %v1861_v20 }
0x137c   : > { %v1875_v30 = vor.u32 1.1754944e-38, %v1874_v40  ;;  %vm1873_vm11 = vcmp.eq.f32.partialorder %v1872_v56, 8.507059e+37 }
0x137f   : > { %v2398_v8 = vpop.eup %2397 }
0x1380   : > { %v2400_v24 = vpop.eup %2399  ;;  %v1862_v13 = vadd.f32 1.0, %v2398_v8 }
0x1381   : > { %v1864_v39 = vmul.f32 %v2400_v24, %v1861_v20  ;;  %vm1869_vm8 = vweird.f32 %v2400_v24 }
0x1382   : > { %2401 = vrcp.f32 %v1862_v13  ;;  %vm1870_vm10 = vmor %vm1868_vm9, %vm1869_vm8  ;;  %v1889_v51 = vand.u32 2147483648, %v1862_v13  ;;  %v1887_v50 = vand.u32 2147483647, %v1862_v13  ;;  %vm1883_vm14 = vweird.f32 %v1862_v13 }
0x1383   : > { %v1865_v37 = vsub.f32 1.0, %v1864_v39 }
0x1384   : > { %v1890_v38 = vor.u32 1.1754944e-38, %v1889_v51  ;;  %vm1888_vm1 = vcmp.eq.f32.partialorder %v1887_v50, 8.507059e+37 }
0x1385   : > { %v1866_v31 = vmul.f32 %v2400_v24, %v1865_v37 }
0x1387   : > { %v1867_v44 = vadd.f32 %v2400_v24, %v1866_v31 }
0x1388   : > { %v2402_v36 = vpop.eup %2401 }
0x1389   : > { %v1871_v45 = vsel %vm1870_vm10, %v2400_v24, %v1867_v44  ;;  %v1879_v48 = vmul.f32 %v2402_v36, %v1862_v13  ;;  %vm1884_vm13 = vweird.f32 %v2402_v36  ;;  %v1551_v24 = vrot.slane %v3099_v6, 4 }
0x138a   : > { %v1876_v60 = vsel %vm1873_vm11, %v1875_v30, %v1871_v45  ;;  %vm1885_vm15 = vmor %vm1883_vm14, %vm1884_vm13 }
0x138b   : > { %v1893_v47 = vmul.f32 2.0, %v1876_v60  ;;  %v1880_v49 = vsub.f32 1.0, %v1879_v48  ;;  %v1552_v13 = vadd.f32 %v1551_v24, %v3099_v6 }
0x138d   : > { %v2235_v46 = vadd.f32 -1.0, %v1893_v47  ;;  %v1881_v53 = vmul.f32 %v2402_v36, %v1880_v49  ;;  %v1553_v39 = vrot.slane %v1552_v13, 2 }
0x138f   : > { %v1897_v55 = vsel %vm661_vm7, %v1876_v60, %v2235_v46  ;;  %v1882_v43 = vadd.f32 %v2402_v36, %v1881_v53  ;;  %v1554_v37 = vadd.f32 %v1553_v39, %v1552_v13 }
0x1390   : > { %1901 = vrot.lane.b32.xlu2 %v1897_v55, %s2535_s26  ;;  %v1917_v14 = vmul.f32 %v1912_v54, %v1897_v55 }
0x1391   : > { %v1886_v3 = vsel %vm1885_vm15, %v2402_v36, %v1882_v43  ;;  %v1555_v40 = vrot.slane %v1554_v37, 1 }
0x1392   : > { %1921 = vrot.lane.b32.xlu1 %v1917_v14, %s2536_s29  ;;  %v1891_v1 = vsel %vm1888_vm1, %v1890_v38, %v1886_v3 }
0x1393   : > { %v1894_v9 = vmul.f32 2.0, %v1891_v1  ;;  %v1556_v31 = vadd.f32 %v1555_v40, %v1554_v37 }
0x1395   : > { %v2236_v52 = vadd.f32 -1.0, %v1894_v9 }
0x1397   : > { %v1898_v41 = vsel %vm661_vm7, %v1891_v1, %v2236_v52  ;;  %vm1995_vm7 = vcmask 1040384  }
0x1398   : > { %1903 = vrot.lane.b32.xlu0 %v1898_v41, %s2535_s26  ;;  %v1918_v57 = vmul.f32 %v1914_v27, %v1898_v41  ;;  %s614_s26 = scalar_lea.vmem %s3237_s14, %s2190_s6 }
0x139a   : > { %1923 = vrot.lane.b32.xlu2 %v1918_v57, %s2536_s29  ;;  %s2539_s29 = smov 2  }
0x13ea   : > { %v1902_v59 = vpop.permute.xlu2 %1901 }
0x13eb   : > { %v1907_v58 = vmul.f32 %v1902_v59, %v1897_v55 }
0x13f4   : > { %v1924_v61 = vpop.permute.xlu2 %1923 }
0x1404   : > { %v1922_v35 = vpop.permute.xlu1 %1921 }
0x1405   : > { %v1927_v25 = vadd.f32 %v1922_v35, %v1907_v58 }
0x1407   : > { %2403 = vtanh.f32 %v1927_v25 }
0x140a   : > { %v1904_v10 = vpop.permute.xlu0 %1903 }
0x140b   : > { %v1908_v21 = vmul.f32 %v1904_v10, %v1898_v41 }
0x140d   : > { %v2404_v63 = vpop.eup %2403  ;;  %v1928_v29 = vadd.f32 %v1924_v61, %v1908_v21 }
0x140e   : > { %1933 = vrot.lane.b32.xlu0 %v2404_v63, %s2537_s17 }
0x140f   : > { %2405 = vtanh.f32 %v1928_v29 }
0x1415   : > { %v2406_v28 = vpop.eup %2405 }
0x1416   : > { %1935 = vrot.lane.b32.xlu1 %v2406_v28, %s2537_s17 }
0x1480   : > { %v1934_v12 = vpop.permute.xlu0 %1933 }
0x1481   : > { %v1939_v2 = vmul.f32 %v1934_v12, %v1897_v55 }
0x1483   : > { %v1941_v16 = vmul.f32 %v1939_v2, %v2918_v18 }
0x1485   : > { %1945 = vrot.lane.b32.xlu2 %v1941_v16, %s2537_s17 }
0x1488   : > { %v1936_v4 = vpop.permute.xlu1 %1935 }
0x1489   : > { %v1940_v22 = vmul.f32 %v1936_v4, %v1898_v41 }
0x148b   : > { %v1942_v11 = vmul.f32 %v1940_v22, %v2918_v18 }
0x148d   : > { %1947 = vrot.lane.b32.xlu0 %v1942_v11, %s2537_s17 }
0x14df   : > { %v1946_v0 = vpop.permute.xlu2 %1945 }
0x14e0   : > { %v1951_v15 = vsel %vm803_vm12, %v1946_v0, 0.0 }
0x14e1   : > { %1952 = vadd.xlane.f32.xlu1 %v1951_v15 }
0x14ff   : > { %v1948_v20 = vpop.permute.xlu0 %1947 }
0x1500   : > { %v1954_v8 = vsel %vm803_vm12, %v1948_v20, 0.0  ;;  %vm1997_vm12 = vcmask 1041408  }
0x1501   : > { %1955 = vadd.xlane.f32.xlu2 %v1954_v8 }
0x1519   : > { %2002 = vrot.lane.b32.xlu2 %v1556_v31, %s2538_s24 }
0x1554   : > { %v1953_v18 = vpop.xlane.xlu1 %1952 }
0x1555   : > { %v1957_v56 = vadd.f32 %v1953_v18, %v2932_v42 }
0x1557   : > { %v1959_v36 = vmul.f32 %v2749_v34, %v1957_v56  ;;  %v1996_v34 = vsel %vm1995_vm7, %v2941_v26, %v3074_v32 }
0x1559   : > { %v1961_v48 = vsel %vm667_vm0, %v1959_v36, 0.0 }
0x1574   : > { %v1956_v44 = vpop.xlane.xlu2 %1955 }
0x1575   : > { %v1958_v30 = vadd.f32 %v1956_v44, %v2932_v42 }
0x1577   : > { %v1960_v45 = vmul.f32 %v2746_v33, %v1958_v30 }
0x1579   : > { %v1962_v6 = vsel %vm667_vm0, %v1960_v45, 0.0 }
0x157a   : > { %v1963_v60 = vadd.f32 %v1962_v6, %v1961_v48 }
0x157c   : > { %v1964_v47 = vrot.slane %v1963_v60, 4  ;;  %v2003_v61 = vpop.permute.xlu2 %2002 }
0x157e   : > { %v1965_v49 = vadd.f32 %v1964_v47, %v1963_v60 }
0x1580   : > { %v1966_v51 = vrot.slane %v1965_v49, 2 }
0x1582   : > { %v1967_v46 = vadd.f32 %v1966_v51, %v1965_v49 }
0x1584   : > { %v1968_v53 = vrot.slane %v1967_v46, 1 }
0x1586   : > { %v1969_v50 = vadd.f32 %v1968_v53, %v1967_v46 }
0x1588   : > { %v1970_v54 = vsub.f32 %v3071_v19, %v1969_v50 }
0x158a   : > { %v1972_v33 = vperm.slane %v1970_v54, 0 }
0x158c   : > { %v1975_v42 = vmul.f32 %v3077_v62, %v1972_v33  ;;  %v1998_v55 = vsel %vm1997_vm12, %v1996_v34, %v1972_v33  ;;  %v1974_v43 = vmul.f32 %v3082_v7, %v1972_v33 }
0x158d   : > { %2000 = vst.msk [vmem:[%s614_s26] sm:$0x7] %vm1999_vm2, %v1998_v55 }
0x158e   : > { %v1979_v14 = vsel %vm667_vm0, %v1975_v42, 0.0  ;;  %v1976_v19 = vsel %vm667_vm0, %v1974_v43, 0.0  ;;  %vm2010_vm0 = vcmask 15360  }
0x158f   : > { %1980 = vadd.xlane.f32.xlu1 %v1979_v14  ;;  %1977 = vadd.xlane.f32.xlu0 %v1976_v19 }
0x1602   : > { %v1981_v38 = vpop.xlane.xlu1 %1980  ;;  %v1978_v3 = vpop.xlane.xlu0 %1977 }
0x1603   : > { %v1983_v1 = vsub.f32 %v1981_v38, %v3090_v17  ;;  %v1982_v9 = vsub.f32 %v1978_v3, %v3094_v5  ;;  %v1111_v17 = vrot.slane %v2956_v23, 4 }
0x1605   : > { %v1985_v52 = vmul.f32 %v1983_v1, %v1983_v1  ;;  %v1984_v26 = vmul.f32 %v1982_v9, %v1982_v9  ;;  %v1112_v5 = vadd.f32 %v1111_v17, %v2956_v23 }
0x1607   : > { %v1987_v32 = vsel %vm1107_vm6, %v1985_v52, 0.0  ;;  %v1986_v62 = vsel %vm1107_vm6, %v1984_v26, 0.0  ;;  %v1113_v25 = vrot.slane %v1112_v5, 2 }
0x1608   : > { %v1988_v7 = vadd.f32 %v1987_v32, %v1986_v62 }
0x1609   : > { %v1114_v10 = vadd.f32 %v1113_v25, %v1112_v5 }
0x160a   : > { %v1989_v27 = vrot.slane %v1988_v7, 4 }
0x160b   : > { %v1115_v21 = vrot.slane %v1114_v10, 1 }
0x160c   : > { %v1990_v41 = vadd.f32 %v1989_v27, %v1988_v7 }
0x160d   : > { %v1116_v63 = vadd.f32 %v1115_v21, %v1114_v10 }
0x160e   : > { %v1991_v57 = vrot.slane %v1990_v41, 2 }
0x160f   : > { %v2009_v29 = vsel %vm1107_vm6, %v1116_v63, %v2003_v61 }
0x1610   : > { %v1992_v59 = vadd.f32 %v1991_v57, %v1990_v41 }
0x1612   : > { %v1993_v58 = vrot.slane %v1992_v59, 1 }
0x1614   : > { %v1994_v35 = vadd.f32 %v1993_v58, %v1992_v59 }
0x1616   : > { %2006 = vrot.lane.b32.xlu0 %v1994_v35, %s2539_s29 }
0x1688   : > { %v2007_v28 = vpop.permute.xlu0 %2006 }
0x1689   : > { %v2011_v12 = vsel %vm2010_vm0, %v2009_v29, %v2007_v28 }
0x168a   : > { %2013 = vst.msk [vmem:[%s617_s19] sm:$0x1] %vm2012_vm3, %v2011_v12 }
0x168b PF: > { %s31_s20 = sadd.s32 1, %s2525_s20  }
0x168c   : > { %p28_p7 = scmp.ge.s32.totalorder %s31_s20, 4  }
0x168e   :  { %30 = sbr.rel (!%p28_p7) target bundleno = 8 (0x8), region = 146 }
0x1693   :  { %2045 = vsyncpa [#allocation4], 1 }
0x1694   :  { %2047 = vsyncpa [#allocation4 + $0x1], 1 }
0x1695   :  { %2048 = vsyncpa [#allocation8], 1 }
0x1696   :  { %2049 = vsyncpa [#allocation5], 1 }
0x1697   :  { %2051 = vsyncpa [#allocation5 + $0x1], 1 }
0x1698   :  { %2052 = vsyncpa [#allocation6], 1 }
0x1699   :  { %2054 = vsyncpa [#allocation6 + $0x1], 1 }

</bundles_post_ra>
